<compile_context>
chip_gen: v5e
topology: v5e:2x2
jax: 0.10.0
libtpu: 0.0.40
codegen_flags: <defaults>
</compile_context>

<pallas_src>
import functools

import jax
import jax.numpy as jnp
from jax.experimental import pallas as pl
from jax.experimental.pallas import tpu as pltpu

H1 = 512
H2 = 256
LANE = 128
SUBLANE_BF16 = 16  # bf16 sublane packing: batch rows padded to a multiple of this


def dqn_kernel(x_ref, w1_ref, b1_ref, w2_ref, b2_ref, w3_ref, b3_ref, o_ref):
    # fc1 + relu: bf16 operands on the MXU, f32 accumulate, f32 bias/ReLU.
    h1 = jnp.dot(x_ref[...], w1_ref[...], preferred_element_type=jnp.float32)
    h1 = jnp.maximum(h1 + b1_ref[...], 0.0)
    # fc2 + relu
    h2 = jnp.dot(h1.astype(jnp.bfloat16), w2_ref[...],
                 preferred_element_type=jnp.float32)
    h2 = jnp.maximum(h2 + b2_ref[...], 0.0)
    # fc3 (no activation); output columns padded to 128 -> lane-dense store.
    o = jnp.dot(h2.astype(jnp.bfloat16), w3_ref[...],
                preferred_element_type=jnp.float32)
    o_ref[...] = (o + b3_ref[...]).astype(o_ref.dtype)


def prepare_params(params):
    """One-time parameter prep (outside the hot path).

    Casts weights to bf16 and pads fc3 output columns to a multiple of 128
    lanes. Weights are stored transposed vs PyTorch: (in_features, out_features).
    Returns (prepped_params_dict, output_size).
    """
    w1 = params["w1"].astype(jnp.bfloat16)
    w2 = params["w2"].astype(jnp.bfloat16)
    w3 = params["w3"].astype(jnp.float32)
    b1 = params["b1"].astype(jnp.float32).reshape(1, -1)
    b2 = params["b2"].astype(jnp.float32).reshape(1, -1)
    b3 = params["b3"].astype(jnp.float32).reshape(1, -1)

    out_size = w3.shape[1]
    out_pad = ((out_size + LANE - 1) // LANE) * LANE
    w3p = (jnp.zeros((w3.shape[0], out_pad), jnp.bfloat16)
           .at[:, :out_size].set(w3.astype(jnp.bfloat16)))
    b3p = jnp.zeros((1, out_pad), jnp.float32).at[:, :out_size].set(b3)

    prepped = {"w1": w1, "b1": b1, "w2": w2, "b2": b2, "w3p": w3p, "b3p": b3p}
    return prepped, out_size


def _num_tensorcores():
    """Best-effort TensorCore count per chip (2 on v7x megacore, else 1)."""
    try:
        dev = jax.devices()[0]
        for attr in ("num_cores", "core_count", "num_tensorcores"):
            n = getattr(dev, attr, None)
            if isinstance(n, int) and n > 0:
                return max(1, min(int(n), 2))
    except Exception:
        pass
    return 1


@functools.partial(jax.jit, static_argnames=("out_size", "num_tiles"))
def _dqn_forward(x, prepped, *, out_size, num_tiles):
    """Hot path: only the x cast/pad, the fused kernel, and the output slice."""
    B, in_size = x.shape
    w1, b1 = prepped["w1"], prepped["b1"]
    w2, b2 = prepped["w2"], prepped["b2"]
    w3p, b3p = prepped["w3p"], prepped["b3p"]
    out_pad = w3p.shape[1]

    # Adaptive batch padding: multiple of num_tiles * 16 (bf16 sublane) rows.
    row_mult = num_tiles * SUBLANE_BF16
    b_pad = ((B + row_mult - 1) // row_mult) * row_mult
    tb = b_pad // num_tiles

    xb = x.astype(jnp.bfloat16)
    if b_pad != B:
        xb = jnp.zeros((b_pad, in_size), jnp.bfloat16).at[:B].set(xb)

    flops = 2 * b_pad * (in_size * H1 + H1 * H2 + H2 * out_pad)
    bytes_accessed = (xb.size * 2 + w1.size * 2 + w2.size * 2 + w3p.size * 2
                      + (b1.size + b2.size + b3p.size) * 4
                      + b_pad * out_pad * 4)

    # Weights / biases stay VMEM-resident across all batch tiles.
    resident = lambda arr: pl.BlockSpec(arr.shape, lambda i: (0, 0))

    out = pl.pallas_call(
        dqn_kernel,
        out_shape=jax.ShapeDtypeStruct((b_pad, out_pad), jnp.float32),
        grid=(num_tiles,),
        in_specs=[
            pl.BlockSpec((tb, in_size), lambda i: (i, 0)),
            resident(w1), resident(b1),
            resident(w2), resident(b2),
            resident(w3p), resident(b3p),
        ],
        out_specs=pl.BlockSpec((tb, out_pad), lambda i: (i, 0)),
        compiler_params=pltpu.CompilerParams(
            dimension_semantics=("parallel",),
        ),
        cost_estimate=pl.CostEstimate(
            flops=flops, transcendentals=0, bytes_accessed=bytes_accessed),
    )(xb, w1, b1, w2, b2, w3p, b3p)

    # Keep the slice: padded Q columns are exactly 0.0 and must never reach an
    # argmax over actions.
    return out[:B, :out_size]


def dqn_forward(x, prepped, out_size, *, num_tiles=None):
    """x: (B, input_size) float32. prepped: output of prepare_params()."""
    if num_tiles is None:
        num_tiles = _num_tensorcores()
    return _dqn_forward(x, prepped, out_size=out_size, num_tiles=num_tiles)


def init_dqn_params(key, input_size, output_size):
    """Deterministic synthetic init (PyTorch Linear-like uniform fan-in bound)."""
    ks = jax.random.split(key, 6)

    def linear(kw, kb, fan_in, fan_out):
        bound = 1.0 / jnp.sqrt(jnp.float32(fan_in))
        w = jax.random.uniform(kw, (fan_in, fan_out), jnp.float32, -bound, bound)
        b = jax.random.uniform(kb, (1, fan_out), jnp.float32, -bound, bound)
        return w, b

    w1, b1 = linear(ks[0], ks[1], input_size, H1)
    w2, b2 = linear(ks[2], ks[3], H1, H2)
    w3, b3 = linear(ks[4], ks[5], H2, output_size)
    return {"w1": w1, "b1": b1, "w2": w2, "b2": b2, "w3": w3, "b3": b3}


def dqn_reference(x, p):
    """JAX reference mirroring the kernel's bf16-operand / f32-accumulate numerics."""
    bf16, f32 = jnp.bfloat16, jnp.float32
    h1 = jnp.maximum(
        jnp.dot(x.astype(bf16), p["w1"].astype(bf16), preferred_element_type=f32)
        + p["b1"], 0.0)
    h2 = jnp.maximum(
        jnp.dot(h1.astype(bf16), p["w2"].astype(bf16), preferred_element_type=f32)
        + p["b2"], 0.0)
    return (jnp.dot(h2.astype(bf16), p["w3"].astype(bf16), preferred_element_type=f32)
            + p["b3"])


if __name__ == "__main__":
    input_size = 16    # state-vector size for the curling game
    output_size = 4    # number of discrete actions

    key = jax.random.PRNGKey(0)
    kx, kp, kx2 = jax.random.split(key, 3)

    params = init_dqn_params(kp, input_size, output_size)
    prepped, out_size = prepare_params(params)          # one-time prep
    prepped = jax.block_until_ready(prepped)

    # Replay-sized batch.
    x = jax.random.normal(kx, (256, input_size), jnp.float32)
    out = jax.block_until_ready(dqn_forward(x, prepped, out_size))
    ref = dqn_reference(x, params)
    assert out.shape == (256, output_size)
    assert jnp.allclose(out, ref, atol=2e-3, rtol=2e-3), "mismatch vs JAX reference"

    # Small online-acting batch (exercises adaptive batch padding).
    x_small = jax.random.normal(kx2, (3, input_size), jnp.float32)
    out_small = jax.block_until_ready(dqn_forward(x_small, prepped, out_size))
    ref_small = dqn_reference(x_small, params)
    assert out_small.shape == (3, output_size)
    assert jnp.allclose(out_small, ref_small, atol=2e-3, rtol=2e-3), "small-batch mismatch"

    print("KERNEL_OK")
</pallas_src>

<mosaic_0001>
module attributes {stable_mosaic.version = 11 : i64} {
  func.func @dqn_kernel(%arg0: i32, %arg1: memref<256x16xbf16, #tpu.memory_space<vmem>>, %arg2: memref<16x512xbf16, #tpu.memory_space<vmem>>, %arg3: memref<1x512xf32, #tpu.memory_space<vmem>>, %arg4: memref<512x256xbf16, #tpu.memory_space<vmem>>, %arg5: memref<1x256xf32, #tpu.memory_space<vmem>>, %arg6: memref<256x128xbf16, #tpu.memory_space<vmem>>, %arg7: memref<1x128xf32, #tpu.memory_space<vmem>>, %arg8: memref<256x128xf32, #tpu.memory_space<vmem>>) attributes {dimension_semantics = [#tpu.dimension_semantics<parallel>], iteration_bounds = array<i64: 1>, scalar_prefetch = 0 : i64, scratch_operands = 0 : i64, tpu.core_type = #tpu.core_type<tc>, window_params = [{transform_indices = @transform_0, window_bounds = array<i64: 256, 16>}, {pipeline_mode = #tpu.pipeline_mode<synchronous>, transform_indices = @transform_1, window_bounds = array<i64: 16, 512>}, {pipeline_mode = #tpu.pipeline_mode<synchronous>, transform_indices = @transform_2, window_bounds = array<i64: 1, 512>}, {pipeline_mode = #tpu.pipeline_mode<synchronous>, transform_indices = @transform_3, window_bounds = array<i64: 512, 256>}, {pipeline_mode = #tpu.pipeline_mode<synchronous>, transform_indices = @transform_4, window_bounds = array<i64: 1, 256>}, {pipeline_mode = #tpu.pipeline_mode<synchronous>, transform_indices = @transform_5, window_bounds = array<i64: 256, 128>}, {pipeline_mode = #tpu.pipeline_mode<synchronous>, transform_indices = @transform_6, window_bounds = array<i64: 1, 128>}, {transform_indices = @transform_7, window_bounds = array<i64: 256, 128>}]} {
    %c0 = arith.constant 0 : index
    %c0_0 = arith.constant 0 : index
    %0 = vector.load %arg1[%c0, %c0_0] : memref<256x16xbf16, #tpu.memory_space<vmem>>, vector<256x16xbf16>
    %c0_1 = arith.constant 0 : index
    %c0_2 = arith.constant 0 : index
    %1 = vector.load %arg2[%c0_1, %c0_2] : memref<16x512xbf16, #tpu.memory_space<vmem>>, vector<16x512xbf16>
    %cst = arith.constant dense<0.000000e+00> : vector<256x512xf32>
    %2 = tpu.matmul %0, %1, %cst {dimension_numbers = #tpu.dot_dimension_numbers<[1], [0], [0], [1], [0, 0, 1, 1], [], []>} : vector<256x16xbf16>, vector<16x512xbf16>, vector<256x512xf32> -> vector<256x512xf32>
    %c0_3 = arith.constant 0 : index
    %c0_4 = arith.constant 0 : index
    %3 = vector.load %arg3[%c0_3, %c0_4] : memref<1x512xf32, #tpu.memory_space<vmem>>, vector<1x512xf32>
    %4 = vector.broadcast %3 : vector<1x512xf32> to vector<256x512xf32>
    %5 = arith.addf %2, %4 : vector<256x512xf32>
    %cst_5 = arith.constant 0.000000e+00 : f32
    %6 = vector.broadcast %cst_5 : f32 to vector<256x512xf32>
    %7 = arith.maximumf %5, %6 : vector<256x512xf32>
    %8 = arith.truncf %7 : vector<256x512xf32> to vector<256x512xbf16>
    %c0_6 = arith.constant 0 : index
    %c0_7 = arith.constant 0 : index
    %9 = vector.load %arg4[%c0_6, %c0_7] : memref<512x256xbf16, #tpu.memory_space<vmem>>, vector<512x256xbf16>
    %cst_8 = arith.constant dense<0.000000e+00> : vector<256x256xf32>
    %10 = tpu.matmul %8, %9, %cst_8 {dimension_numbers = #tpu.dot_dimension_numbers<[1], [0], [0], [1], [0, 0, 1, 1], [], []>} : vector<256x512xbf16>, vector<512x256xbf16>, vector<256x256xf32> -> vector<256x256xf32>
    %c0_9 = arith.constant 0 : index
    %c0_10 = arith.constant 0 : index
    %11 = vector.load %arg5[%c0_9, %c0_10] : memref<1x256xf32, #tpu.memory_space<vmem>>, vector<1x256xf32>
    %12 = vector.broadcast %11 : vector<1x256xf32> to vector<256x256xf32>
    %13 = arith.addf %10, %12 : vector<256x256xf32>
    %cst_11 = arith.constant 0.000000e+00 : f32
    %14 = vector.broadcast %cst_11 : f32 to vector<256x256xf32>
    %15 = arith.maximumf %13, %14 : vector<256x256xf32>
    %16 = arith.truncf %15 : vector<256x256xf32> to vector<256x256xbf16>
    %c0_12 = arith.constant 0 : index
    %c0_13 = arith.constant 0 : index
    %17 = vector.load %arg6[%c0_12, %c0_13] : memref<256x128xbf16, #tpu.memory_space<vmem>>, vector<256x128xbf16>
    %cst_14 = arith.constant dense<0.000000e+00> : vector<256x128xf32>
    %18 = tpu.matmul %16, %17, %cst_14 {dimension_numbers = #tpu.dot_dimension_numbers<[1], [0], [0], [1], [0, 0, 1, 1], [], []>} : vector<256x256xbf16>, vector<256x128xbf16>, vector<256x128xf32> -> vector<256x128xf32>
    %c0_15 = arith.constant 0 : index
    %c0_16 = arith.constant 0 : index
    %19 = vector.load %arg7[%c0_15, %c0_16] : memref<1x128xf32, #tpu.memory_space<vmem>>, vector<1x128xf32>
    %20 = vector.broadcast %19 : vector<1x128xf32> to vector<256x128xf32>
    %21 = arith.addf %18, %20 : vector<256x128xf32>
    %c0_17 = arith.constant 0 : index
    %c0_18 = arith.constant 0 : index
    %22 = vector.load %arg8[%c0_17, %c0_18] : memref<256x128xf32, #tpu.memory_space<vmem>>, vector<256x128xf32>
    tpu.vector_store %arg8[%c0_17, %c0_18], %21 {strides = array<i32>} : memref<256x128xf32, #tpu.memory_space<vmem>>, vector<256x128xf32>,
    return
  }
  func.func @transform_0(%arg0: i32) -> (i32, i32) {
    %c0_i32 = arith.constant 0 : i32
    %c0_i32_0 = arith.constant 0 : i32
    return %arg0, %c0_i32 : i32, i32
  }
  func.func @transform_1(%arg0: i32) -> (i32, i32) {
    %c0_i32 = arith.constant 0 : i32
    %c0_i32_0 = arith.constant 0 : i32
    %c0_i32_1 = arith.constant 0 : i32
    return %c0_i32, %c0_i32_0 : i32, i32
  }
  func.func @transform_2(%arg0: i32) -> (i32, i32) {
    %c0_i32 = arith.constant 0 : i32
    %c0_i32_0 = arith.constant 0 : i32
    %c0_i32_1 = arith.constant 0 : i32
    return %c0_i32, %c0_i32_0 : i32, i32
  }
  func.func @transform_3(%arg0: i32) -> (i32, i32) {
    %c0_i32 = arith.constant 0 : i32
    %c0_i32_0 = arith.constant 0 : i32
    %c0_i32_1 = arith.constant 0 : i32
    return %c0_i32, %c0_i32_0 : i32, i32
  }
  func.func @transform_4(%arg0: i32) -> (i32, i32) {
    %c0_i32 = arith.constant 0 : i32
    %c0_i32_0 = arith.constant 0 : i32
    %c0_i32_1 = arith.constant 0 : i32
    return %c0_i32, %c0_i32_0 : i32, i32
  }
  func.func @transform_5(%arg0: i32) -> (i32, i32) {
    %c0_i32 = arith.constant 0 : i32
    %c0_i32_0 = arith.constant 0 : i32
    %c0_i32_1 = arith.constant 0 : i32
    return %c0_i32, %c0_i32_0 : i32, i32
  }
  func.func @transform_6(%arg0: i32) -> (i32, i32) {
    %c0_i32 = arith.constant 0 : i32
    %c0_i32_0 = arith.constant 0 : i32
    %c0_i32_1 = arith.constant 0 : i32
    return %c0_i32, %c0_i32_0 : i32, i32
  }
  func.func @transform_7(%arg0: i32) -> (i32, i32) {
    %c0_i32 = arith.constant 0 : i32
    %c0_i32_0 = arith.constant 0 : i32
    return %arg0, %c0_i32 : i32, i32
  }
}

</mosaic_0001>

<bundles_post_ra>
// kernel: _dqn_forward.1
= control target key start
LH: loop header
LB: loop body
LE: loop exit
PB: predicated region body
PF: predicated region fallthrough
CT: control target
= control target key end

     0   :  { %12 = vsyncpa [#allocation3], 0  ;;  %s2932_s27 = smov [#allocation2]   ;;  %s2933_s29 = smov 128   ;;  %s4163_s0 = inlined_call_operand.vmem [shape: bf16[256,16], index: 0, kind: input, shape index: {}]   ;;  %s4164_s1 = inlined_call_operand.vmem [shape: bf16[16,512], index: 1, kind: input, shape index: {}]   ;;  %s4165_s2 = inlined_call_operand.vmem [shape: f32[1,512], index: 2, kind: input, shape index: {}]   ;;  %s4166_s3 = inlined_call_operand.hbm [shape: bf16[512,256], index: 3, kind: input, shape index: {}]   ;;  %s4167_s4 = inlined_call_operand.vmem [shape: f32[1,256], index: 4, kind: input, shape index: {}]   ;;  %s4168_s5 = inlined_call_operand.vmem [shape: bf16[256,128], index: 5, kind: input, shape index: {}]   ;;  %s4169_s6 = inlined_call_operand.vmem [shape: f32[1,128], index: 6, kind: input, shape index: {}]   ;;  %s4170_s7 = inlined_call_operand.vmem [shape: f32[256,128], index: 7, kind: output, shape index: {}]  }
   0x1   :  { %s23_s26 = sshll.u32 %s4166_s3, 4  ;;  %s25_s28 = sshll.u32 %s2932_s27, 4  ;;  %s24_s26 = int_to_ptr.hbm [resolvable:$true] %s23_s26  ;;  %s26_s28 = int_to_ptr.vmem [resolvable:$true] %s25_s28 }
   0x2   :  { %s2934_s30 = smov 8  }
   0x3   :  { %31 = dma.hbm_to_vmem [thread:$0]  %s24_s26, 8192, %s26_s28, [#allocation3], %s2933_s29, %s2933_s29, %s2934_s30  }
   0x4   :  { %2930 = dma.done.wait [#allocation3], 8192  }
   0x5   :  { %2931 = vsyncadd [#allocation3], 4294959104  ;;  %v2397_v0 = vld [vmem:[%s4164_s1] sm:$0xf]  ;;  %v2813_v1 = vld [vmem:[%s4164_s1 + $0xc] sm:$0xf0] }
   0x6   :  { %v2811_v2 = vld [vmem:[%s4164_s1 + $0x4] sm:$0xf]  ;;  %v2398_v3 = vor.u32 %v2813_v1, %v2397_v0  ;;  %v2399_v4 = vld [vmem:[%s4164_s1 + $0x10] sm:$0xf0]  ;;  %v2405_v8 = vld [vmem:[%s4164_s1 + $0x8] sm:$0xf] }
   0x7   :  { %v2993_v5 = vld [vmem:[%s4163_s0] sm:$0xff]  ;;  %v2402_v7 = vor.u32 %v2811_v2, %v2399_v4  ;;  %v2814_v9 = vld [vmem:[%s4164_s1 + $0x14] sm:$0xf0]  ;;  %v2812_v10 = vld [vmem:[%s4164_s1 + $0xc] sm:$0xf]  ;;  %vm189_vm0 = vcmask 130048  }
   0x8   :  { %v2998_v6 = vld [vmem:[%s4163_s0 + $0x40] sm:$0xff]  ;;  %245 = vmatpush.bf16.msra.mxu0 %v2398_v3  ;;  %2895 = vmatpush.bf16.msra.mxu2 %v2398_v3  ;;  %v2406_v11 = vor.u32 %v2814_v9, %v2405_v8  ;;  %v2407_v12 = vld [vmem:[%s4164_s1 + $0x18] sm:$0xf0]  ;;  %v3023_v14 = vld [vmem:[%s4163_s0 + $0x8] sm:$0xff] }
   0x9   :  { %334 = vmatpush.bf16.msra.mxu1 %v2402_v7  ;;  %2896 = vmatpush.bf16.msra.mxu3 %v2402_v7  ;;  %v2410_v13 = vor.u32 %v2812_v10, %v2407_v12  ;;  %v3028_v15 = vld [vmem:[%s4163_s0 + $0x48] sm:$0xff]  ;;  %v3041_v16 = vld [vmem:[%s4163_s0 + $0x10] sm:$0xff]  ;;  %v3059_v18 = vld [vmem:[%s4163_s0 + $0x18] sm:$0xff] }
   0xa   :  { %v3046_v17 = vld [vmem:[%s4163_s0 + $0x50] sm:$0xff]  ;;  %v3064_v19 = vld [vmem:[%s4163_s0 + $0x58] sm:$0xff]  ;;  %v3077_v20 = vld [vmem:[%s4163_s0 + $0x20] sm:$0xff] }
   0xb   :  { %2411 = vmatmul.msk.bf16.vlgmr.msra.gmra.mxu0 %vm189_vm0, %v2993_v5  ;;  %2419 = vmatmul.msk.bf16.vlgmr.msra.gmra.mxu2 %vm189_vm0, %v2998_v6  ;;  %v2807_v21 = vld [vmem:[%s4163_s0 + $0x60] sm:$0xff]  ;;  %v2533_v22 = vld [vmem:[#allocation2 + $0x70] sm:$0xf]  ;;  %v2830_v23 = vld [vmem:[#allocation2 + $0x74] sm:$0xf0] }
   0xc   :  { %423 = vmatpush.bf16.msrb.mxu2 %v2406_v11  ;;  %2427 = vmatmul.msk.bf16.vlgmr.msra.gmra.mxu1 %vm189_vm0, %v2993_v5  ;;  %v2597_v24 = vld [vmem:[#allocation2 + $0xf0] sm:$0xf]  ;;  %v2534_v25 = vor.u32 %v2830_v23, %v2533_v22  ;;  %v2846_v26 = vld [vmem:[#allocation2 + $0xf4] sm:$0xf0]  ;;  %v3091_v28 = vld [vmem:[%s4163_s0 + $0x28] sm:$0xff] }
   0xd   :  { %2435 = vmatmul.msk.bf16.vlgmr.msra.gmra.mxu3 %vm189_vm0, %v2998_v6  ;;  %v2598_v27 = vor.u32 %v2846_v26, %v2597_v24  ;;  %v2808_v29 = vld [vmem:[%s4163_s0 + $0x68] sm:$0xff]  ;;  %v2525_v30 = vld [vmem:[#allocation2 + $0x60] sm:$0xf]  ;;  %v2517_v36 = vld [vmem:[#allocation2 + $0x50] sm:$0xf] }
   0xe   :  { %512 = vmatpush.bf16.msrb.mxu3 %v2410_v13  ;;  %1176 = vmatpush.bf16.msrb.mxu0 %v2534_v25  ;;  %v2828_v31 = vld [vmem:[#allocation2 + $0x64] sm:$0xf0]  ;;  %v2589_v33 = vld [vmem:[#allocation2 + $0xe0] sm:$0xf]  ;;  %v2826_v37 = vld [vmem:[#allocation2 + $0x54] sm:$0xf0] }
   0xf   :  { %1265 = vmatpush.bf16.msrb.mxu1 %v2598_v27  ;;  %v2526_v32 = vor.u32 %v2828_v31, %v2525_v30  ;;  %v2844_v34 = vld [vmem:[#allocation2 + $0xe4] sm:$0xf0]  ;;  %v2581_v38 = vld [vmem:[#allocation2 + $0xd0] sm:$0xf]  ;;  %v2518_v39 = vor.u32 %v2826_v37, %v2517_v36  ;;  %v2842_v40 = vld [vmem:[#allocation2 + $0xd4] sm:$0xf0] }
  0x10   :  { %v2590_v35 = vor.u32 %v2844_v34, %v2589_v33  ;;  %v2582_v41 = vor.u32 %v2842_v40, %v2581_v38  ;;  %v2509_v42 = vld [vmem:[#allocation2 + $0x40] sm:$0xf]  ;;  %v2824_v43 = vld [vmem:[#allocation2 + $0x44] sm:$0xf0]  ;;  %v2501_v48 = vld [vmem:[#allocation2 + $0x30] sm:$0xf] }
  0x11   :  { %v2573_v44 = vld [vmem:[#allocation2 + $0xc0] sm:$0xf]  ;;  %v2840_v45 = vld [vmem:[#allocation2 + $0xc4] sm:$0xf0]  ;;  %v2510_v46 = vor.u32 %v2824_v43, %v2509_v42  ;;  %v2822_v49 = vld [vmem:[#allocation2 + $0x34] sm:$0xf0] }
  0x12   :  { %1177 = vmatpush.bf16.msrb.mxu0 %v2526_v32  ;;  %v2574_v47 = vor.u32 %v2840_v45, %v2573_v44  ;;  %v2565_v50 = vld [vmem:[#allocation2 + $0xb0] sm:$0xf]  ;;  %v2502_v53 = vor.u32 %v2822_v49, %v2501_v48  ;;  %v2838_v54 = vld [vmem:[#allocation2 + $0xb4] sm:$0xf0]  ;;  %v2493_v56 = vld [vmem:[#allocation2 + $0x20] sm:$0xf] }
  0x13   :  { %1266 = vmatpush.bf16.msrb.mxu1 %v2590_v35  ;;  %v3105_v51 = vld [vmem:[%s4163_s0 + $0x30] sm:$0xff]  ;;  %v2566_v55 = vor.u32 %v2838_v54, %v2565_v50  ;;  %v2820_v57 = vld [vmem:[#allocation2 + $0x24] sm:$0xf0]  ;;  %v2557_v58 = vld [vmem:[#allocation2 + $0xa0] sm:$0xf] }
  0x14   :  { %v2809_v52 = vld [vmem:[%s4163_s0 + $0x70] sm:$0xff]  ;;  %v2494_v59 = vor.u32 %v2820_v57, %v2493_v56  ;;  %v2836_v60 = vld [vmem:[#allocation2 + $0xa4] sm:$0xf0]  ;;  %v2862_v62 = vld [vmem:[#allocation2 + $0x174] sm:$0xf0] }
  0x15   :  { %v2661_v61 = vld [vmem:[#allocation2 + $0x170] sm:$0xf]  ;;  %v2558_v63 = vor.u32 %v2836_v60, %v2557_v58  ;;  %v2878_v2 = vld [vmem:[#allocation2 + $0x1f4] sm:$0xf0]  ;;  %v2477_v12 = vld [vmem:[#allocation2] sm:$0xf] }
  0x16   :  { %1178 = vmatpush.bf16.msrb.mxu0 %v2518_v39  ;;  %v2725_v0 = vld [vmem:[#allocation2 + $0x1f0] sm:$0xf]  ;;  %v2662_v1 = vor.u32 %v2862_v62, %v2661_v61  ;;  %v2818_v7 = vld [vmem:[#allocation2 + $0x14] sm:$0xf0]  ;;  %v2816_v13 = vld [vmem:[#allocation2 + $0x4] sm:$0xf0] }
  0x17   :  { %1267 = vmatpush.bf16.msrb.mxu1 %v2582_v41  ;;  %v2726_v3 = vor.u32 %v2878_v2, %v2725_v0  ;;  %v2485_v4 = vld [vmem:[#allocation2 + $0x10] sm:$0xf]  ;;  %v2834_v10 = vld [vmem:[#allocation2 + $0x94] sm:$0xf0]  ;;  %v2478_v22 = vor.u32 %v2816_v13, %v2477_v12  ;;  %v2832_v23 = vld [vmem:[#allocation2 + $0x84] sm:$0xf0] }
  0x18   :  { %v2549_v8 = vld [vmem:[#allocation2 + $0x90] sm:$0xf]  ;;  %1354 = vmatpush.bf16.msra.mxu2 %v2662_v1  ;;  %v2486_v9 = vor.u32 %v2818_v7, %v2485_v4  ;;  %v3119_v25 = vld [vmem:[%s4163_s0 + $0x38] sm:$0xff]  ;;  %v3133_v27 = vld [vmem:[%s4165_s2] sm:$0xf] }
  0x19   :  { %1443 = vmatpush.bf16.msra.mxu3 %v2726_v3  ;;  %v2550_v11 = vor.u32 %v2834_v10, %v2549_v8  ;;  %v2810_v26 = vld [vmem:[%s4163_s0 + $0x78] sm:$0xff]  ;;  %v3136_v31 = vperm.slane %v3133_v27, 1  ;;  %v3139_v32 = vperm.slane %v3133_v27, 0  ;;  %v2653_v33 = vld [vmem:[#allocation2 + $0x160] sm:$0xf] }
  0x1a   :  { %1179 = vmatpush.bf16.msrb.mxu0 %v2510_v46  ;;  %v2860_v34 = vld [vmem:[#allocation2 + $0x164] sm:$0xf0]  ;;  %v2717_v37 = vld [vmem:[#allocation2 + $0x1e0] sm:$0xf] }
  0x1b   :  { %2412 = vmatmul.msk.bf16.gmra.mxu0 %vm189_vm0, %v3023_v14  ;;  %2420 = vmatmul.msk.bf16.gmra.mxu2 %vm189_vm0, %v3028_v15  ;;  %v2654_v36 = vor.u32 %v2860_v34, %v2653_v33  ;;  %v2876_v38 = vld [vmem:[#allocation2 + $0x1e4] sm:$0xf0] }
  0x1c   :  { %2428 = vmatmul.msk.bf16.gmra.mxu1 %vm189_vm0, %v3023_v14  ;;  %v2718_v41 = vor.u32 %v2876_v38, %v2717_v37 }
  0x1d   :  { %2436 = vmatmul.msk.bf16.gmra.mxu3 %vm189_vm0, %v3028_v15  ;;  %1268 = vmatpush.bf16.msrb.mxu1 %v2574_v47 }
  0x1e   :  { %1180 = vmatpush.bf16.msrb.mxu0 %v2502_v53  ;;  %1355 = vmatpush.bf16.msra.mxu2 %v2654_v36 }
  0x1f   :  { %1444 = vmatpush.bf16.msra.mxu3 %v2718_v41 }
  0x21   :  { %1269 = vmatpush.bf16.msrb.mxu1 %v2566_v55 }
  0x22   :  { %1181 = vmatpush.bf16.msrb.mxu0 %v2494_v59 }
  0x25   :  { %1270 = vmatpush.bf16.msrb.mxu1 %v2558_v63 }
  0x26   :  { %1182 = vmatpush.bf16.msrb.mxu0 %v2486_v9 }
  0x29   :  { %1271 = vmatpush.bf16.msrb.mxu1 %v2550_v11 }
  0x2a   :  { %1183 = vmatpush.bf16.msrb.mxu0 %v2478_v22 }
  0x2b   :  { %2413 = vmatmul.msk.bf16.gmra.mxu0 %vm189_vm0, %v3041_v16  ;;  %2421 = vmatmul.msk.bf16.gmra.mxu2 %vm189_vm0, %v3046_v17 }
  0x2c   :  { %2429 = vmatmul.msk.bf16.gmra.mxu1 %vm189_vm0, %v3041_v16 }
  0x2d   :  { %2437 = vmatmul.msk.bf16.gmra.mxu3 %vm189_vm0, %v3046_v17 }
  0x3b   :  { %2414 = vmatmul.msk.bf16.gmra.mxu0 %vm189_vm0, %v3059_v18  ;;  %2422 = vmatmul.msk.bf16.gmra.mxu2 %vm189_vm0, %v3064_v19 }
  0x3c   :  { %2430 = vmatmul.msk.bf16.gmra.mxu1 %vm189_vm0, %v3059_v18 }
  0x3d   :  { %2438 = vmatmul.msk.bf16.gmra.mxu3 %vm189_vm0, %v3064_v19 }
  0x4b   :  { %2415 = vmatmul.msk.bf16.gmra.mxu0 %vm189_vm0, %v3077_v20  ;;  %2423 = vmatmul.msk.bf16.gmra.mxu2 %vm189_vm0, %v2807_v21 }
  0x4c   :  { %2431 = vmatmul.msk.bf16.gmra.mxu1 %vm189_vm0, %v3077_v20 }
  0x4d   :  { %2439 = vmatmul.msk.bf16.gmra.mxu3 %vm189_vm0, %v2807_v21  ;;  %v2541_v21 = vld [vmem:[#allocation2 + $0x80] sm:$0xf] }
  0x4e   :  { %v2542_v24 = vor.u32 %v2832_v23, %v2541_v21 }
  0x50   :  { %1272 = vmatpush.bf16.msrb.mxu1 %v2542_v24 }
  0x5b   :  { %2416 = vmatmul.msk.bf16.gmra.mxu0 %vm189_vm0, %v3091_v28  ;;  %2424 = vmatmul.msk.bf16.gmra.mxu2 %vm189_vm0, %v2808_v29 }
  0x5c   :  { %2432 = vmatmul.msk.bf16.gmra.mxu1 %vm189_vm0, %v3091_v28 }
  0x5d   :  { %2440 = vmatmul.msk.bf16.gmra.mxu3 %vm189_vm0, %v2808_v29 }
  0x6b   :  { %2417 = vmatmul.msk.bf16.gmra.mxu0 %vm189_vm0, %v3105_v51  ;;  %2425 = vmatmul.msk.bf16.gmra.mxu2 %vm189_vm0, %v2809_v52 }
  0x6c   :  { %2433 = vmatmul.msk.bf16.gmra.mxu1 %vm189_vm0, %v3105_v51 }
  0x6d   :  { %2441 = vmatmul.msk.bf16.gmra.mxu3 %vm189_vm0, %v2809_v52 }
  0x7b   :  { %2418 = vmatmul.msk.bf16.gmra.mxu0 %vm189_vm0, %v3119_v25  ;;  %2426 = vmatmul.msk.bf16.gmra.mxu2 %vm189_vm0, %v2810_v26 }
  0x7c   :  { %2434 = vmatmul.msk.bf16.gmra.mxu1 %vm189_vm0, %v3119_v25 }
  0x7d   :  { %2442 = vmatmul.msk.bf16.gmra.mxu3 %vm189_vm0, %v2810_v26 }
  0x88   :  { %v247_v29 = vpop.f32.mrf.mxu0 }
  0x89   :  { %v336_v30 = vpop.f32.mrf.mxu1  ;;  %v248_v35 = vadd.f32 %v247_v29, %v3139_v32 }
  0x8a   :  { %v337_v39 = vadd.f32 %v336_v30, %v3136_v31 }
  0x8b   :  { %2443 = vmatmul.msk.bf16.vlgmr.msrb.gmra.mxu2 %vm189_vm0, %v2993_v5  ;;  %v594_v44 = vmax.f32 %v248_v35, 0.0 }
  0x8d   :  { %2459 = vmatmul.msk.bf16.vlgmr.msrb.gmra.mxu3 %vm189_vm0, %v2993_v5  ;;  %v595_v5 = vmax.f32 %v337_v39, 0.0 }
  0x8e   :  { %v287_v40 = vpop.f32.mrf.mxu2 }
  0x8f   :  { %v288_v50 = vadd.f32 %v287_v40, %v3139_v32 }
  0x90   :  { %v376_v42 = vpop.f32.mrf.mxu3  ;;  %v249_v43 = vpop.f32.mrf.mxu0 }
  0x91   :  { %v250_v45 = vadd.f32 %v249_v43, %v3139_v32  ;;  %v338_v46 = vpop.f32.mrf.mxu1  ;;  %v377_v53 = vadd.f32 %v376_v42, %v3136_v31  ;;  %v658_v60 = vmax.f32 %v288_v50, 0.0  ;;  %v2645_v43 = vld [vmem:[#allocation2 + $0x150] sm:$0xf] }
  0x92   :  { %v339_v47 = vadd.f32 %v338_v46, %v3136_v31 }
  0x93   :  { %v598_v48 = vmax.f32 %v250_v45, 0.0  ;;  %v659_v63 = vmax.f32 %v377_v53, 0.0 }
  0x94   :  { %v599_v49 = vmax.f32 %v339_v47, 0.0  ;;  %v2709_v47 = vld [vmem:[#allocation2 + $0x1d0] sm:$0xf] }
  0x95   :  { %v3150_v52 = vpack.c.bf16 %v598_v48, %v594_v44  ;;  %v2858_v44 = vld [vmem:[#allocation2 + $0x154] sm:$0xf0] }
  0x96   :  { %v289_v54 = vpop.f32.mrf.mxu2  ;;  %v3153_v55 = vpack.c.bf16 %v599_v49, %v595_v5  ;;  %v2646_v5 = vor.u32 %v2858_v44, %v2645_v43  ;;  %v2874_v48 = vld [vmem:[#allocation2 + $0x1d4] sm:$0xf0] }
  0x97   :  { %v290_v56 = vadd.f32 %v289_v54, %v3139_v32  ;;  %1184 = vmatmul.bf16.vlgmr.msrb.gmra.mxu0 %v3150_v52  ;;  %v2710_v53 = vor.u32 %v2874_v48, %v2709_v47 }
  0x98   :  { %v378_v57 = vpop.f32.mrf.mxu3  ;;  %1273 = vmatmul.bf16.vlgmr.msrb.gmra.mxu1 %v3153_v55  ;;  %v252_v59 = vpop.f32.mrf.mxu0  ;;  %1356 = vmatpush.bf16.msra.mxu2 %v2646_v5 }
  0x99   :  { %v379_v58 = vadd.f32 %v378_v57, %v3136_v31  ;;  %v662_v61 = vmax.f32 %v290_v56, 0.0  ;;  %v341_v62 = vpop.f32.mrf.mxu1  ;;  %v253_v3 = vadd.f32 %v252_v59, %v3139_v32  ;;  %1445 = vmatpush.bf16.msra.mxu3 %v2710_v53 }
  0x9a   :  { %v342_v4 = vadd.f32 %v341_v62, %v3136_v31 }
  0x9b   :  { %v663_v0 = vmax.f32 %v379_v58, 0.0  ;;  %2444 = vmatmul.msk.bf16.gmra.mxu2 %vm189_vm0, %v3023_v14  ;;  %v3161_v1 = vpack.c.bf16 %v662_v61, %v658_v60  ;;  %v602_v10 = vmax.f32 %v253_v3, 0.0 }
  0x9c   :  { %v603_v13 = vmax.f32 %v342_v4, 0.0 }
  0x9d   :  { %2460 = vmatmul.msk.bf16.gmra.mxu3 %vm189_vm0, %v3023_v14  ;;  %v3165_v2 = vpack.c.bf16 %v663_v0, %v659_v63 }
  0x9e   :  { %v292_v7 = vpop.f32.mrf.mxu2 }
  0x9f   :  { %v293_v14 = vadd.f32 %v292_v7, %v3139_v32 }
  0xa0   :  { %v381_v8 = vpop.f32.mrf.mxu3  ;;  %v254_v9 = vpop.f32.mrf.mxu0 }
  0xa1   :  { %v255_v11 = vadd.f32 %v254_v9, %v3139_v32  ;;  %v343_v12 = vpop.f32.mrf.mxu1  ;;  %v382_v26 = vadd.f32 %v381_v8, %v3136_v31  ;;  %v666_v37 = vmax.f32 %v293_v14, 0.0 }
  0xa2   :  { %v344_v21 = vadd.f32 %v343_v12, %v3136_v31 }
  0xa3   :  { %v606_v22 = vmax.f32 %v255_v11, 0.0  ;;  %v667_v40 = vmax.f32 %v382_v26, 0.0 }
  0xa4   :  { %v607_v23 = vmax.f32 %v344_v21, 0.0 }
  0xa5   :  { %v3172_v24 = vpack.c.bf16 %v606_v22, %v602_v10 }
  0xa6   :  { %v294_v29 = vpop.f32.mrf.mxu2  ;;  %v3175_v30 = vpack.c.bf16 %v607_v23, %v603_v13 }
  0xa7   :  { %v295_v33 = vadd.f32 %v294_v29, %v3139_v32  ;;  %1189 = vmatmul.bf16.gmra.mxu0 %v3172_v24 }
  0xa8   :  { %v383_v34 = vpop.f32.mrf.mxu3  ;;  %1278 = vmatmul.bf16.gmra.mxu1 %v3175_v30  ;;  %v257_v36 = vpop.f32.mrf.mxu0 }
  0xa9   :  { %v384_v35 = vadd.f32 %v383_v34, %v3136_v31  ;;  %v670_v38 = vmax.f32 %v295_v33, 0.0  ;;  %v346_v39 = vpop.f32.mrf.mxu1  ;;  %v258_v46 = vadd.f32 %v257_v36, %v3139_v32 }
  0xaa   :  { %v347_v49 = vadd.f32 %v346_v39, %v3136_v31 }
  0xab   :  { %v671_v41 = vmax.f32 %v384_v35, 0.0  ;;  %2445 = vmatmul.msk.bf16.gmra.mxu2 %vm189_vm0, %v3041_v16  ;;  %v3183_v42 = vpack.c.bf16 %v670_v38, %v666_v37  ;;  %v610_v57 = vmax.f32 %v258_v46, 0.0 }
  0xac   :  { %v611_v59 = vmax.f32 %v347_v49, 0.0 }
  0xad   :  { %2461 = vmatmul.msk.bf16.gmra.mxu3 %vm189_vm0, %v3041_v16  ;;  %v3187_v45 = vpack.c.bf16 %v671_v41, %v667_v40 }
  0xae   :  { %v297_v50 = vpop.f32.mrf.mxu2 }
  0xaf   :  { %4201 = vst [vmem:[#allocation5_spill] sm:$0xff] %v3187_v45  ;;  %v298_v63 = vadd.f32 %v297_v50, %v3139_v32 }
  0xb0   :  { %v386_v54 = vpop.f32.mrf.mxu3  ;;  %v259_v56 = vpop.f32.mrf.mxu0 }
  0xb1   :  { %v260_v16 = vadd.f32 %v259_v56, %v3139_v32  ;;  %v348_v58 = vpop.f32.mrf.mxu1  ;;  %v387_v3 = vadd.f32 %v386_v54, %v3136_v31  ;;  %v674_v12 = vmax.f32 %v298_v63, 0.0 }
  0xb2   :  { %v349_v60 = vadd.f32 %v348_v58, %v3136_v31 }
  0xb3   :  { %v614_v61 = vmax.f32 %v260_v16, 0.0  ;;  %v675_v22 = vmax.f32 %v387_v3, 0.0 }
  0xb4   :  { %v615_v62 = vmax.f32 %v349_v60, 0.0 }
  0xb5   :  { %v3194_v0 = vpack.c.bf16 %v614_v61, %v610_v57  ;;  %v2637_v61 = vld [vmem:[#allocation2 + $0x140] sm:$0xf] }
  0xb6   :  { %v299_v4 = vpop.f32.mrf.mxu2  ;;  %v3197_v7 = vpack.c.bf16 %v615_v62, %v611_v59  ;;  %v2856_v62 = vld [vmem:[#allocation2 + $0x144] sm:$0xf0] }
  0xb7   :  { %v300_v8 = vadd.f32 %v299_v4, %v3139_v32  ;;  %1194 = vmatmul.bf16.gmra.mxu0 %v3194_v0  ;;  %v2638_v4 = vor.u32 %v2856_v62, %v2637_v61 }
  0xb8   :  { %v388_v9 = vpop.f32.mrf.mxu3  ;;  %1283 = vmatmul.bf16.gmra.mxu1 %v3197_v7  ;;  %v262_v11 = vpop.f32.mrf.mxu0 }
  0xb9   :  { %v389_v10 = vadd.f32 %v388_v9, %v3136_v31  ;;  %v678_v13 = vmax.f32 %v300_v8, 0.0  ;;  %v351_v21 = vpop.f32.mrf.mxu1  ;;  %v263_v29 = vadd.f32 %v262_v11, %v3139_v32  ;;  %v2701_v8 = vld [vmem:[#allocation2 + $0x1c0] sm:$0xf]  ;;  %v2872_v9 = vld [vmem:[#allocation2 + $0x1c4] sm:$0xf0]  ;;  %1357 = vmatpush.bf16.msra.mxu2 %v2638_v4 }
  0xba   :  { %v352_v33 = vadd.f32 %v351_v21, %v3136_v31 }
  0xbb   :  { %v679_v23 = vmax.f32 %v389_v10, 0.0  ;;  %2446 = vmatmul.msk.bf16.gmra.mxu2 %vm189_vm0, %v3059_v18  ;;  %v3205_v14 = vpack.c.bf16 %v678_v13, %v674_v12  ;;  %v618_v37 = vmax.f32 %v263_v29, 0.0  ;;  %v2702_v12 = vor.u32 %v2872_v9, %v2701_v8 }
  0xbc   :  { %v619_v40 = vmax.f32 %v352_v33, 0.0 }
  0xbd   :  { %4202 = vst [vmem:[#allocation6_spill] sm:$0xff] %v3205_v14  ;;  %2462 = vmatmul.msk.bf16.gmra.mxu3 %vm189_vm0, %v3059_v18  ;;  %v3209_v26 = vpack.c.bf16 %v679_v23, %v675_v22 }
  0xbe   :  { %v302_v34 = vpop.f32.mrf.mxu2  ;;  %1446 = vmatpush.bf16.msra.mxu3 %v2702_v12 }
  0xbf   :  { %4203 = vst [vmem:[#allocation7_spill] sm:$0xff] %v3209_v26  ;;  %v303_v18 = vadd.f32 %v302_v34, %v3139_v32 }
  0xc0   :  { %v391_v35 = vpop.f32.mrf.mxu3  ;;  %v264_v36 = vpop.f32.mrf.mxu0 }
  0xc1   :  { %v265_v38 = vadd.f32 %v264_v36, %v3139_v32  ;;  %v353_v39 = vpop.f32.mrf.mxu1  ;;  %v392_v5 = vadd.f32 %v391_v35, %v3136_v31  ;;  %v682_v56 = vmax.f32 %v303_v18, 0.0 }
  0xc2   :  { %v354_v41 = vadd.f32 %v353_v39, %v3136_v31 }
  0xc3   :  { %v622_v43 = vmax.f32 %v265_v38, 0.0  ;;  %v683_v58 = vmax.f32 %v392_v5, 0.0 }
  0xc4   :  { %v623_v44 = vmax.f32 %v354_v41, 0.0 }
  0xc5   :  { %v3216_v46 = vpack.c.bf16 %v622_v43, %v618_v37 }
  0xc6   :  { %v304_v47 = vpop.f32.mrf.mxu2  ;;  %v3219_v48 = vpack.c.bf16 %v623_v44, %v619_v40 }
  0xc7   :  { %v305_v49 = vadd.f32 %v304_v47, %v3139_v32  ;;  %1199 = vmatmul.bf16.gmra.mxu0 %v3216_v46 }
  0xc8   :  { %v393_v50 = vpop.f32.mrf.mxu3  ;;  %1288 = vmatmul.bf16.gmra.mxu1 %v3219_v48  ;;  %v267_v54 = vpop.f32.mrf.mxu0 }
  0xc9   :  { %v394_v53 = vadd.f32 %v393_v50, %v3136_v31  ;;  %v686_v57 = vmax.f32 %v305_v49, 0.0  ;;  %v356_v16 = vpop.f32.mrf.mxu1  ;;  %v268_v3 = vadd.f32 %v267_v54, %v3139_v32 }
  0xca   :  { %v357_v10 = vadd.f32 %v356_v16, %v3136_v31 }
  0xcb   :  { %v687_v59 = vmax.f32 %v394_v53, 0.0  ;;  %2447 = vmatmul.msk.bf16.gmra.mxu2 %vm189_vm0, %v3077_v20  ;;  %v3227_v60 = vpack.c.bf16 %v686_v57, %v682_v56  ;;  %v626_v22 = vmax.f32 %v268_v3, 0.0 }
  0xcc   :  { %v627_v29 = vmax.f32 %v357_v10, 0.0 }
  0xcd   :  { %4204 = vst [vmem:[#allocation8_spill] sm:$0xff] %v3227_v60  ;;  %2463 = vmatmul.msk.bf16.gmra.mxu3 %vm189_vm0, %v3077_v20  ;;  %v3231_v63 = vpack.c.bf16 %v687_v59, %v683_v58 }
  0xce   :  { %v307_v11 = vpop.f32.mrf.mxu2 }
  0xcf   :  { %4205 = vst [vmem:[#allocation9_spill] sm:$0xff] %v3231_v63  ;;  %v308_v36 = vadd.f32 %v307_v11, %v3139_v32 }
  0xd0   :  { %v396_v13 = vpop.f32.mrf.mxu3  ;;  %v269_v21 = vpop.f32.mrf.mxu0 }
  0xd1   :  { %v270_v20 = vadd.f32 %v269_v21, %v3139_v32  ;;  %v358_v23 = vpop.f32.mrf.mxu1  ;;  %v397_v38 = vadd.f32 %v396_v13, %v3136_v31  ;;  %v690_v5 = vmax.f32 %v308_v36, 0.0 }
  0xd2   :  { %v359_v33 = vadd.f32 %v358_v23, %v3136_v31 }
  0xd3   :  { %v630_v34 = vmax.f32 %v270_v20, 0.0  ;;  %v691_v50 = vmax.f32 %v397_v38, 0.0 }
  0xd4   :  { %v631_v35 = vmax.f32 %v359_v33, 0.0 }
  0xd5   :  { %v3238_v37 = vpack.c.bf16 %v630_v34, %v626_v22 }
  0xd6   :  { %v309_v39 = vpop.f32.mrf.mxu2  ;;  %v3241_v40 = vpack.c.bf16 %v631_v35, %v627_v29 }
  0xd7   :  { %v310_v41 = vadd.f32 %v309_v39, %v3139_v32  ;;  %1204 = vmatmul.bf16.gmra.mxu0 %v3238_v37 }
  0xd8   :  { %v398_v43 = vpop.f32.mrf.mxu3  ;;  %1293 = vmatmul.bf16.gmra.mxu1 %v3241_v40  ;;  %v272_v18 = vpop.f32.mrf.mxu0 }
  0xd9   :  { %v399_v44 = vadd.f32 %v398_v43, %v3136_v31  ;;  %v694_v47 = vmax.f32 %v310_v41, 0.0  ;;  %v361_v49 = vpop.f32.mrf.mxu1  ;;  %v273_v57 = vadd.f32 %v272_v18, %v3139_v32  ;;  %v2629_v43 = vld [vmem:[#allocation2 + $0x130] sm:$0xf] }
  0xda   :  { %v362_v16 = vadd.f32 %v361_v49, %v3136_v31  ;;  %v2693_v49 = vld [vmem:[#allocation2 + $0x1b0] sm:$0xf] }
  0xdb   :  { %v695_v53 = vmax.f32 %v399_v44, 0.0  ;;  %2448 = vmatmul.msk.bf16.gmra.mxu2 %vm189_vm0, %v3091_v28  ;;  %v3249_v54 = vpack.c.bf16 %v694_v47, %v690_v5  ;;  %v634_v62 = vmax.f32 %v273_v57, 0.0  ;;  %v2854_v44 = vld [vmem:[#allocation2 + $0x134] sm:$0xf0] }
  0xdc   :  { %v635_v8 = vmax.f32 %v362_v16, 0.0  ;;  %v2630_v47 = vor.u32 %v2854_v44, %v2629_v43 }
  0xdd   :  { %4206 = vst [vmem:[#allocation10_spill] sm:$0xff] %v3249_v54  ;;  %2464 = vmatmul.msk.bf16.gmra.mxu3 %vm189_vm0, %v3091_v28  ;;  %v3253_v56 = vpack.c.bf16 %v695_v53, %v691_v50  ;;  %v2870_v50 = vld [vmem:[#allocation2 + $0x1b4] sm:$0xf0] }
  0xde   :  { %v312_v58 = vpop.f32.mrf.mxu2  ;;  %v2694_v16 = vor.u32 %v2870_v50, %v2693_v49  ;;  %1358 = vmatpush.bf16.msra.mxu2 %v2630_v47 }
  0xdf   :  { %4207 = vst [vmem:[#allocation11_spill] sm:$0xff] %v3253_v56  ;;  %v313_v28 = vadd.f32 %v312_v58, %v3139_v32 }
  0xe0   :  { %v401_v59 = vpop.f32.mrf.mxu3  ;;  %v274_v61 = vpop.f32.mrf.mxu0  ;;  %1447 = vmatpush.bf16.msra.mxu3 %v2694_v16 }
  0xe1   :  { %v275_v3 = vadd.f32 %v274_v61, %v3139_v32  ;;  %v363_v4 = vpop.f32.mrf.mxu1  ;;  %v402_v13 = vadd.f32 %v401_v59, %v3136_v31  ;;  %v698_v34 = vmax.f32 %v313_v28, 0.0 }
  0xe2   :  { %v364_v9 = vadd.f32 %v363_v4, %v3136_v31 }
  0xe3   :  { %v638_v10 = vmax.f32 %v275_v3, 0.0  ;;  %v699_v38 = vmax.f32 %v402_v13, 0.0 }
  0xe4   :  { %v639_v11 = vmax.f32 %v364_v9, 0.0 }
  0xe5   :  { %v3260_v12 = vpack.c.bf16 %v638_v10, %v634_v62 }
  0xe6   :  { %v314_v21 = vpop.f32.mrf.mxu2  ;;  %v3263_v22 = vpack.c.bf16 %v639_v11, %v635_v8 }
  0xe7   :  { %v315_v20 = vadd.f32 %v314_v21, %v3139_v32  ;;  %1209 = vmatmul.bf16.gmra.mxu0 %v3260_v12 }
  0xe8   :  { %v403_v23 = vpop.f32.mrf.mxu3  ;;  %1298 = vmatmul.bf16.gmra.mxu1 %v3263_v22  ;;  %v277_v33 = vpop.f32.mrf.mxu0 }
  0xe9   :  { %v404_v29 = vadd.f32 %v403_v23, %v3136_v31  ;;  %v702_v35 = vmax.f32 %v315_v20, 0.0  ;;  %v366_v36 = vpop.f32.mrf.mxu1  ;;  %v278_v5 = vadd.f32 %v277_v33, %v3139_v32 }
  0xea   :  { %v367_v53 = vadd.f32 %v366_v36, %v3136_v31 }
  0xeb   :  { %v703_v39 = vmax.f32 %v404_v29, 0.0  ;;  %2449 = vmatmul.msk.bf16.gmra.mxu2 %vm189_vm0, %v3105_v51  ;;  %v3271_v41 = vpack.c.bf16 %v702_v35, %v698_v34  ;;  %v642_v61 = vmax.f32 %v278_v5, 0.0 }
  0xec   :  { %v643_v3 = vmax.f32 %v367_v53, 0.0  ;;  %v2829_v53 = vld [vmem:[#allocation2 + $0x74] sm:$0xf] }
  0xed   :  { %4208 = vst [vmem:[#allocation12_spill] sm:$0xff] %v3271_v41  ;;  %2465 = vmatmul.msk.bf16.gmra.mxu3 %vm189_vm0, %v3105_v51  ;;  %v3275_v18 = vpack.c.bf16 %v703_v39, %v699_v38 }
  0xee   :  { %v317_v57 = vpop.f32.mrf.mxu2 }
  0xef   :  { %4209 = vst [vmem:[#allocation13_spill] sm:$0xff] %v3275_v18  ;;  %v318_v10 = vadd.f32 %v317_v57, %v3139_v32  ;;  %v2535_v57 = vld [vmem:[#allocation2 + $0x78] sm:$0xf0] }
  0xf0   :  { %v406_v58 = vpop.f32.mrf.mxu3  ;;  %v279_v59 = vpop.f32.mrf.mxu0 }
  0xf1   :  { %v280_v51 = vadd.f32 %v279_v59, %v3139_v32  ;;  %v368_v62 = vpop.f32.mrf.mxu1  ;;  %v407_v28 = vadd.f32 %v406_v58, %v3136_v31  ;;  %v706_v34 = vmax.f32 %v318_v10, 0.0  ;;  %v2538_v58 = vor.u32 %v2829_v53, %v2535_v57  ;;  %v850_v57 = vld [vmem:[%s4167_s4] sm:$0x3] }
  0xf2   :  { %v369_v4 = vadd.f32 %v368_v62, %v3136_v31 }
  0xf3   :  { %v646_v8 = vmax.f32 %v280_v51, 0.0  ;;  %v707_v38 = vmax.f32 %v407_v28, 0.0  ;;  %1532 = vmatpush.bf16.msra.mxu0 %v2538_v58  ;;  %v2685_v58 = vld [vmem:[#allocation2 + $0x1a0] sm:$0xf] }
  0xf4   :  { %v647_v9 = vmax.f32 %v369_v4, 0.0  ;;  %v2599_v4 = vld [vmem:[#allocation2 + $0xf8] sm:$0xf0] }
  0xf5   :  { %v3282_v11 = vpack.c.bf16 %v646_v8, %v642_v61 }
  0xf6   :  { %v319_v13 = vpop.f32.mrf.mxu2  ;;  %v3285_v21 = vpack.c.bf16 %v647_v9, %v643_v3 }
  0xf7   :  { %v320_v20 = vadd.f32 %v319_v13, %v3139_v32  ;;  %1214 = vmatmul.bf16.gmra.mxu0 %v3282_v11 }
  0xf8   :  { %v408_v23 = vpop.f32.mrf.mxu3  ;;  %1303 = vmatmul.bf16.gmra.mxu1 %v3285_v21  ;;  %v282_v33 = vpop.f32.mrf.mxu0 }
  0xf9   :  { %v409_v29 = vadd.f32 %v408_v23, %v3136_v31  ;;  %v710_v35 = vmax.f32 %v320_v20, 0.0  ;;  %v371_v36 = vpop.f32.mrf.mxu1  ;;  %v283_v5 = vadd.f32 %v282_v33, %v3139_v32 }
  0xfa   :  { %v372_v47 = vadd.f32 %v371_v36, %v3136_v31 }
  0xfb   :  { %v711_v39 = vmax.f32 %v409_v29, 0.0  ;;  %2450 = vmatmul.msk.bf16.gmra.mxu2 %vm189_vm0, %v3119_v25  ;;  %v3293_v43 = vpack.c.bf16 %v710_v35, %v706_v34  ;;  %v650_v59 = vmax.f32 %v283_v5, 0.0 }
  0xfc   :  { %v651_v62 = vmax.f32 %v372_v47, 0.0 }
  0xfd   :  { %2466 = vmatmul.msk.bf16.gmra.mxu3 %vm189_vm0, %v3119_v25  ;;  %v3297_v44 = vpack.c.bf16 %v711_v39, %v707_v38  ;;  %v2845_v25 = vld [vmem:[#allocation2 + $0xf4] sm:$0xf] }
  0xfe   :  { %v322_v49 = vpop.f32.mrf.mxu2  ;;  %v2602_v9 = vor.u32 %v2845_v25, %v2599_v4 }
  0xff   :  { %v323_v28 = vadd.f32 %v322_v49, %v3139_v32  ;;  %v2852_v49 = vld [vmem:[#allocation2 + $0x124] sm:$0xf0] }
 0x100   :  { %v411_v50 = vpop.f32.mrf.mxu3  ;;  %v284_v16 = vpop.f32.mrf.mxu0  ;;  %1621 = vmatpush.bf16.msra.mxu1 %v2602_v9 }
 0x101   :  { %v285_v61 = vadd.f32 %v284_v16, %v3139_v32  ;;  %v373_v51 = vpop.f32.mrf.mxu1  ;;  %v412_v20 = vadd.f32 %v411_v50, %v3136_v31  ;;  %v714_v36 = vmax.f32 %v323_v28, 0.0 }
 0x102   :  { %v374_v3 = vadd.f32 %v373_v51, %v3136_v31  ;;  %v3325_v51 = vperm.slane %v3133_v27, 2 }
 0x103   :  { %v654_v8 = vmax.f32 %v285_v61, 0.0  ;;  %v715_v39 = vmax.f32 %v412_v20, 0.0 }
 0x104   :  { %v655_v10 = vmax.f32 %v374_v3, 0.0 }
 0x105   :  { %v3304_v13 = vpack.c.bf16 %v654_v8, %v650_v59  ;;  %v2868_v59 = vld [vmem:[#allocation2 + $0x1a4] sm:$0xf0] }
 0x106   :  { %v324_v23 = vpop.f32.mrf.mxu2  ;;  %v3307_v29 = vpack.c.bf16 %v655_v10, %v651_v62  ;;  %v2686_v61 = vor.u32 %v2868_v59, %v2685_v58  ;;  %v3327_v62 = vperm.slane %v850_v57, 0  ;;  %v2527_v58 = vld [vmem:[#allocation2 + $0x68] sm:$0xf0] }
 0x107   :  { %v325_v33 = vadd.f32 %v324_v23, %v3139_v32  ;;  %1219 = vmatmul.bf16.gmra.mxu0 %v3304_v13  ;;  %v2621_v32 = vld [vmem:[#allocation2 + $0x120] sm:$0xf] }
 0x108   :  { %v413_v34 = vpop.f32.mrf.mxu3  ;;  %1308 = vmatmul.bf16.gmra.mxu1 %v3307_v29  ;;  %v2622_v53 = vor.u32 %v2852_v49, %v2621_v32  ;;  %1448 = vmatpush.bf16.msra.mxu3 %v2686_v61  ;;  %v2843_v61 = vld [vmem:[#allocation2 + $0xe4] sm:$0xf] }
 0x109   :  { %v414_v35 = vadd.f32 %v413_v34, %v3136_v31  ;;  %v718_v38 = vmax.f32 %v325_v33, 0.0 }
 0x10a   :  { %1359 = vmatpush.bf16.msra.mxu2 %v2622_v53 }
 0x10b   :  { %v719_v5 = vmax.f32 %v414_v35, 0.0  ;;  %2451 = vmatmul.msk.bf16.gmra.mxu2 %vm189_vm0, %v2998_v6  ;;  %v3315_v47 = vpack.c.bf16 %v718_v38, %v714_v36 }
 0x10d   :  { %4210 = vst [vmem:[#allocation14_spill] sm:$0xff] %v3315_v47  ;;  %2467 = vmatmul.msk.bf16.gmra.mxu3 %vm189_vm0, %v2998_v6  ;;  %v3319_v50 = vpack.c.bf16 %v719_v5, %v715_v39  ;;  %v3330_v6 = vperm.slane %v3133_v27, 3 }
 0x10e   :  { %v425_v31 = vpop.f32.mrf.mxu2 }
 0x10f   :  { %4211 = vst [vmem:[#allocation15_spill] sm:$0xff] %v3319_v50  ;;  %v426_v25 = vadd.f32 %v425_v31, %v3325_v51 }
 0x110   :  { %v514_v16 = vpop.f32.mrf.mxu3 }
 0x111   :  { %v515_v9 = vadd.f32 %v514_v16, %v3330_v6  ;;  %v596_v33 = vmax.f32 %v426_v25, 0.0  ;;  %v2827_v16 = vld [vmem:[#allocation2 + $0x64] sm:$0xf] }
 0x112   :  { %v2530_v59 = vor.u32 %v2827_v16, %v2527_v58  ;;  %v2850_v16 = vld [vmem:[#allocation2 + $0x114] sm:$0xf0] }
 0x113   :  { %v597_v35 = vmax.f32 %v515_v9, 0.0 }
 0x114   :  { %v1185_v3 = vpop.f32.mrf.mxu0  ;;  %1533 = vmatpush.bf16.msra.mxu0 %v2530_v59 }
 0x115   :  { %v1186_v4 = vadd.f32 %v1185_v3, %v3327_v62  ;;  %v1274_v8 = vpop.f32.mrf.mxu1  ;;  %v2591_v3 = vld [vmem:[#allocation2 + $0xe8] sm:$0xf0] }
 0x116   :  { %v427_v10 = vpop.f32.mrf.mxu2  ;;  %v2594_v25 = vor.u32 %v2843_v61, %v2591_v3 }
 0x117   :  { %v3335_v28 = vadd.f32 %v1274_v8, %v1186_v4  ;;  %v428_v20 = vadd.f32 %v427_v10, %v3325_v51  ;;  %1224 = vmatmul.bf16.gmra.mxu0 %v3161_v1 }
 0x118   :  { %v516_v23 = vpop.f32.mrf.mxu3  ;;  %1313 = vmatmul.bf16.gmra.mxu1 %v3165_v2 }
 0x119   :  { %v517_v27 = vadd.f32 %v516_v23, %v3330_v6  ;;  %v600_v34 = vmax.f32 %v428_v20, 0.0  ;;  %1622 = vmatpush.bf16.msra.mxu1 %v2594_v25 }
 0x11b   :  { %v601_v36 = vmax.f32 %v517_v27, 0.0  ;;  %v3341_v38 = vpack.c.bf16 %v600_v34, %v596_v33  ;;  %2452 = vmatmul.msk.bf16.gmra.mxu2 %vm189_vm0, %v3028_v15 }
 0x11c   :  { %v1187_v5 = vpop.f32.mrf.mxu0 }
 0x11d   :  { %4212 = vst [vmem:[#allocation16_spill] sm:$0xff] %v3341_v38  ;;  %v3345_v39 = vpack.c.bf16 %v601_v36, %v597_v35  ;;  %2468 = vmatmul.msk.bf16.gmra.mxu3 %vm189_vm0, %v3028_v15  ;;  %v1188_v32 = vadd.f32 %v1187_v5, %v3327_v62  ;;  %v1276_v49 = vpop.f32.mrf.mxu1 }
 0x11e   :  { %v430_v53 = vpop.f32.mrf.mxu2 }
 0x11f   :  { %4213 = vst [vmem:[#allocation17_spill] sm:$0xff] %v3345_v39  ;;  %v3350_v31 = vadd.f32 %v1276_v49, %v1188_v32  ;;  %v431_v8 = vadd.f32 %v430_v53, %v3325_v51 }
 0x120   :  { %v519_v57 = vpop.f32.mrf.mxu3 }
 0x121   :  { %v520_v10 = vadd.f32 %v519_v57, %v3330_v6  ;;  %v604_v35 = vmax.f32 %v431_v8, 0.0  ;;  %v2613_v57 = vld [vmem:[#allocation2 + $0x110] sm:$0xf] }
 0x122   :  { %v2614_v3 = vor.u32 %v2850_v16, %v2613_v57 }
 0x123   :  { %v605_v5 = vmax.f32 %v520_v10, 0.0 }
 0x124   :  { %v1190_v4 = vpop.f32.mrf.mxu0  ;;  %1360 = vmatpush.bf16.msra.mxu2 %v2614_v3 }
 0x125   :  { %v1191_v15 = vadd.f32 %v1190_v4, %v3327_v62  ;;  %v1279_v9 = vpop.f32.mrf.mxu1 }
 0x126   :  { %v432_v20 = vpop.f32.mrf.mxu2 }
 0x127   :  { %v3355_v23 = vadd.f32 %v1279_v9, %v1191_v15  ;;  %v433_v27 = vadd.f32 %v432_v20, %v3325_v51  ;;  %1229 = vmatmul.bf16.gmra.mxu0 %v3183_v42  ;;  %v2677_v15 = vld [vmem:[#allocation2 + $0x190] sm:$0xf]  ;;  %v2866_v9 = vld [vmem:[#allocation2 + $0x194] sm:$0xf0] }
 0x128   :  { %v521_v33 = vpop.f32.mrf.mxu3  ;;  %1318 = vmatmul.bf16.gmra.mxu1 %v3187_v45  ;;  %v2678_v10 = vor.u32 %v2866_v9, %v2677_v15 }
 0x129   :  { %v522_v34 = vadd.f32 %v521_v33, %v3330_v6  ;;  %v608_v36 = vmax.f32 %v433_v27, 0.0 }
 0x12a   :  { %1449 = vmatpush.bf16.msra.mxu3 %v2678_v10 }
 0x12b   :  { %v609_v32 = vmax.f32 %v522_v34, 0.0  ;;  %2453 = vmatmul.msk.bf16.gmra.mxu2 %vm189_vm0, %v3046_v17  ;;  %v3363_v49 = vpack.c.bf16 %v608_v36, %v604_v35 }
 0x12c   :  { %v1192_v53 = vpop.f32.mrf.mxu0 }
 0x12d   :  { %2469 = vmatmul.msk.bf16.gmra.mxu3 %vm189_vm0, %v3046_v17  ;;  %v3367_v58 = vpack.c.bf16 %v609_v32, %v605_v5  ;;  %v1193_v59 = vadd.f32 %v1192_v53, %v3327_v62  ;;  %v1281_v61 = vpop.f32.mrf.mxu1 }
 0x12e   :  { %v435_v25 = vpop.f32.mrf.mxu2 }
 0x12f   :  { %4214 = vst [vmem:[#allocation18_spill] sm:$0xff] %v3367_v58  ;;  %v3370_v4 = vadd.f32 %v1281_v61, %v1193_v59  ;;  %v436_v17 = vadd.f32 %v435_v25, %v3325_v51 }
 0x130   :  { %v524_v8 = vpop.f32.mrf.mxu3 }
 0x131   :  { %v525_v34 = vadd.f32 %v524_v8, %v3330_v6  ;;  %v612_v57 = vmax.f32 %v436_v17, 0.0 }
 0x133   :  { %v613_v59 = vmax.f32 %v525_v34, 0.0 }
 0x134   :  { %v1195_v20 = vpop.f32.mrf.mxu0 }
 0x135   :  { %v1196_v27 = vadd.f32 %v1195_v20, %v3327_v62  ;;  %v1284_v33 = vpop.f32.mrf.mxu1 }
 0x136   :  { %v437_v35 = vpop.f32.mrf.mxu2 }
 0x137   :  { %v3375_v36 = vadd.f32 %v1284_v33, %v1196_v27  ;;  %v438_v5 = vadd.f32 %v437_v35, %v3325_v51  ;;  %1234 = vmatmul.bf16.gmra.mxu0 %v3205_v14  ;;  %v2825_v27 = vld [vmem:[#allocation2 + $0x54] sm:$0xf]  ;;  %v2519_v33 = vld [vmem:[#allocation2 + $0x58] sm:$0xf0] }
 0x138   :  { %v526_v32 = vpop.f32.mrf.mxu3  ;;  %1323 = vmatmul.bf16.gmra.mxu1 %v3209_v26  ;;  %v2522_v34 = vor.u32 %v2825_v27, %v2519_v33  ;;  %v2841_v35 = vld [vmem:[#allocation2 + $0xd4] sm:$0xf] }
 0x139   :  { %4215 = vst [vmem:[#allocation19_spill] sm:$0xff] %v3375_v36  ;;  %v527_v53 = vadd.f32 %v526_v32, %v3330_v6  ;;  %v616_v16 = vmax.f32 %v438_v5, 0.0  ;;  %v2583_v5 = vld [vmem:[#allocation2 + $0xd8] sm:$0xf0] }
 0x13a   :  { %1534 = vmatpush.bf16.msra.mxu0 %v2522_v34  ;;  %v2586_v32 = vor.u32 %v2841_v35, %v2583_v5 }
 0x13b   :  { %v617_v61 = vmax.f32 %v527_v53, 0.0  ;;  %2454 = vmatmul.msk.bf16.gmra.mxu2 %vm189_vm0, %v3064_v19  ;;  %v3383_v3 = vpack.c.bf16 %v616_v16, %v612_v57 }
 0x13c   :  { %v1197_v25 = vpop.f32.mrf.mxu0  ;;  %1623 = vmatpush.bf16.msra.mxu1 %v2586_v32 }
 0x13d   :  { %4216 = vst [vmem:[#allocation20_spill] sm:$0xff] %v3383_v3  ;;  %2470 = vmatmul.msk.bf16.gmra.mxu3 %vm189_vm0, %v3064_v19  ;;  %v3387_v8 = vpack.c.bf16 %v617_v61, %v613_v59  ;;  %v1198_v15 = vadd.f32 %v1197_v25, %v3327_v62  ;;  %v1286_v9 = vpop.f32.mrf.mxu1 }
 0x13e   :  { %v440_v10 = vpop.f32.mrf.mxu2 }
 0x13f   :  { %4217 = vst [vmem:[#allocation21_spill] sm:$0xff] %v3387_v8  ;;  %v3390_v20 = vadd.f32 %v1286_v9, %v1198_v15  ;;  %v441_v19 = vadd.f32 %v440_v10, %v3325_v51 }
 0x140   :  { %v529_v17 = vpop.f32.mrf.mxu3 }
 0x141   :  { %4218 = vst [vmem:[#allocation22_spill] sm:$0xff] %v3390_v20  ;;  %v530_v59 = vadd.f32 %v529_v17, %v3330_v6  ;;  %v620_v33 = vmax.f32 %v441_v19, 0.0  ;;  %v2901_v17 = vld [vmem:[%s4163_s0 + $0x60] sm:$0xff]  ;;  %v2727_v20 = vld [vmem:[#allocation2 + $0x1f8] sm:$0xf0] }
 0x143   :  { %v621_v34 = vmax.f32 %v530_v59, 0.0 }
 0x144   :  { %v1200_v53 = vpop.f32.mrf.mxu0 }
 0x145   :  { %v1201_v57 = vadd.f32 %v1200_v53, %v3327_v62  ;;  %v1289_v16 = vpop.f32.mrf.mxu1  ;;  %v2605_v53 = vld [vmem:[#allocation2 + $0x100] sm:$0xf] }
 0x146   :  { %v442_v61 = vpop.f32.mrf.mxu2 }
 0x147   :  { %v3395_v25 = vadd.f32 %v1289_v16, %v1201_v57  ;;  %v443_v15 = vadd.f32 %v442_v61, %v3325_v51  ;;  %1239 = vmatmul.bf16.gmra.mxu0 %v3227_v60  ;;  %v2848_v57 = vld [vmem:[#allocation2 + $0x104] sm:$0xf0] }
 0x148   :  { %v531_v9 = vpop.f32.mrf.mxu3  ;;  %1328 = vmatmul.bf16.gmra.mxu1 %v3231_v63  ;;  %v2606_v59 = vor.u32 %v2848_v57, %v2605_v53  ;;  %v2669_v63 = vld [vmem:[#allocation2 + $0x180] sm:$0xf]  ;;  %v2864_v60 = vld [vmem:[#allocation2 + $0x184] sm:$0xf0] }
 0x149   :  { %4219 = vst [vmem:[#allocation23_spill] sm:$0xff] %v3395_v25  ;;  %v532_v27 = vadd.f32 %v531_v9, %v3330_v6  ;;  %v624_v10 = vmax.f32 %v443_v15, 0.0 }
 0x14a   :  { %1361 = vmatpush.bf16.msra.mxu2 %v2606_v59 }
 0x14b   :  { %v625_v35 = vmax.f32 %v532_v27, 0.0  ;;  %2455 = vmatmul.msk.bf16.gmra.mxu2 %vm189_vm0, %v2901_v17  ;;  %v3405_v5 = vpack.c.bf16 %v624_v10, %v620_v33  ;;  %v2670_v33 = vor.u32 %v2864_v60, %v2669_v63 }
 0x14c   :  { %v1202_v32 = vpop.f32.mrf.mxu0 }
 0x14d   :  { %2471 = vmatmul.msk.bf16.gmra.mxu3 %vm189_vm0, %v2901_v17  ;;  %v3408_v16 = vpack.c.bf16 %v625_v35, %v621_v34  ;;  %v1203_v19 = vadd.f32 %v1202_v32, %v3327_v62  ;;  %v1291_v61 = vpop.f32.mrf.mxu1 }
 0x14e   :  { %v445_v15 = vpop.f32.mrf.mxu2  ;;  %1450 = vmatpush.bf16.msra.mxu3 %v2670_v33 }
 0x14f   :  { %4220 = vst [vmem:[#allocation24_spill] sm:$0xff] %v3408_v16  ;;  %v3411_v9 = vadd.f32 %v1291_v61, %v1203_v19  ;;  %v446_v17 = vadd.f32 %v445_v15, %v3325_v51  ;;  %v2902_v15 = vld [vmem:[%s4163_s0 + $0x68] sm:$0xff] }
 0x150   :  { %v534_v27 = vpop.f32.mrf.mxu3 }
 0x151   :  { %4221 = vst [vmem:[#allocation25_spill] sm:$0xff] %v3411_v9  ;;  %v535_v35 = vadd.f32 %v534_v27, %v3330_v6  ;;  %v628_v60 = vmax.f32 %v446_v17, 0.0 }
 0x153   :  { %v629_v61 = vmax.f32 %v535_v35, 0.0 }
 0x154   :  { %v1205_v10 = vpop.f32.mrf.mxu0 }
 0x155   :  { %v1206_v25 = vadd.f32 %v1205_v10, %v3327_v62  ;;  %v1294_v34 = vpop.f32.mrf.mxu1 }
 0x156   :  { %v447_v32 = vpop.f32.mrf.mxu2 }
 0x157   :  { %v3416_v26 = vadd.f32 %v1294_v34, %v1206_v25  ;;  %v448_v53 = vadd.f32 %v447_v32, %v3325_v51  ;;  %1244 = vmatmul.bf16.gmra.mxu0 %v3249_v54  ;;  %v2575_v54 = vld [vmem:[#allocation2 + $0xc8] sm:$0xf0] }
 0x158   :  { %v536_v57 = vpop.f32.mrf.mxu3  ;;  %1333 = vmatmul.bf16.gmra.mxu1 %v3253_v56  ;;  %v2839_v56 = vld [vmem:[#allocation2 + $0xc4] sm:$0xf] }
 0x159   :  { %4222 = vst [vmem:[#allocation26_spill] sm:$0xff] %v3416_v26  ;;  %v537_v19 = vadd.f32 %v536_v57, %v3330_v6  ;;  %v632_v63 = vmax.f32 %v448_v53, 0.0  ;;  %v2823_v53 = vld [vmem:[#allocation2 + $0x44] sm:$0xf]  ;;  %v2511_v57 = vld [vmem:[#allocation2 + $0x48] sm:$0xf0] }
 0x15b   :  { %v633_v59 = vmax.f32 %v537_v19, 0.0  ;;  %2456 = vmatmul.msk.bf16.gmra.mxu2 %vm189_vm0, %v2902_v15  ;;  %v3426_v25 = vpack.c.bf16 %v632_v63, %v628_v60  ;;  %v2514_v19 = vor.u32 %v2823_v53, %v2511_v57  ;;  %v2578_v60 = vor.u32 %v2839_v56, %v2575_v54  ;;  %v2567_v56 = vld [vmem:[#allocation2 + $0xb8] sm:$0xf0] }
 0x15c   :  { %v1207_v27 = vpop.f32.mrf.mxu0 }
 0x15d   :  { %4223 = vst [vmem:[#allocation27_spill] sm:$0xff] %v3426_v25  ;;  %2472 = vmatmul.msk.bf16.gmra.mxu3 %vm189_vm0, %v2902_v15  ;;  %v3429_v33 = vpack.c.bf16 %v633_v59, %v629_v61  ;;  %v1208_v10 = vadd.f32 %v1207_v27, %v3327_v62  ;;  %v1296_v34 = vpop.f32.mrf.mxu1  ;;  %1535 = vmatpush.bf16.msra.mxu0 %v2514_v19 }
 0x15e   :  { %v450_v17 = vpop.f32.mrf.mxu2  ;;  %1624 = vmatpush.bf16.msra.mxu1 %v2578_v60 }
 0x15f   :  { %4224 = vst [vmem:[#allocation28_spill] sm:$0xff] %v3429_v33  ;;  %v3432_v32 = vadd.f32 %v1296_v34, %v1208_v10  ;;  %v451_v15 = vadd.f32 %v450_v17, %v3325_v51  ;;  %v2821_v10 = vld [vmem:[#allocation2 + $0x34] sm:$0xf]  ;;  %v2503_v34 = vld [vmem:[#allocation2 + $0x38] sm:$0xf0] }
 0x160   :  { %v539_v35 = vpop.f32.mrf.mxu3  ;;  %v2506_v54 = vor.u32 %v2821_v10, %v2503_v34  ;;  %v2835_v34 = vld [vmem:[#allocation2 + $0xa4] sm:$0xf] }
 0x161   :  { %4225 = vst [vmem:[#allocation29_spill] sm:$0xff] %v3432_v32  ;;  %v540_v27 = vadd.f32 %v539_v35, %v3330_v6  ;;  %v2837_v32 = vld [vmem:[#allocation2 + $0xb4] sm:$0xf]  ;;  %v636_v60 = vmax.f32 %v451_v15, 0.0 }
 0x162   :  { %v2570_v19 = vor.u32 %v2837_v32, %v2567_v56  ;;  %1536 = vmatpush.bf16.msra.mxu0 %v2506_v54  ;;  %v2861_v15 = vld [vmem:[#allocation2 + $0x174] sm:$0xf] }
 0x164   :  { %v1210_v63 = vpop.f32.mrf.mxu0  ;;  %1625 = vmatpush.bf16.msra.mxu1 %v2570_v19 }
 0x165   :  { %v1211_v61 = vadd.f32 %v1210_v63, %v3327_v62  ;;  %v1299_v59 = vpop.f32.mrf.mxu1  ;;  %v637_v63 = vmax.f32 %v540_v27, 0.0  ;;  %v2663_v27 = vld [vmem:[#allocation2 + $0x178] sm:$0xf0] }
 0x166   :  { %v452_v26 = vpop.f32.mrf.mxu2  ;;  %v2666_v19 = vor.u32 %v2861_v15, %v2663_v27  ;;  %v2831_v15 = vld [vmem:[#allocation2 + $0x84] sm:$0xf]  ;;  %v2543_v27 = vld [vmem:[#allocation2 + $0x88] sm:$0xf0] }
 0x167   :  { %v3437_v9 = vadd.f32 %v1299_v59, %v1211_v61  ;;  %v453_v53 = vadd.f32 %v452_v26, %v3325_v51  ;;  %1249 = vmatmul.bf16.gmra.mxu0 %v3271_v41  ;;  %v2819_v61 = vld [vmem:[#allocation2 + $0x24] sm:$0xf]  ;;  %v2495_v59 = vld [vmem:[#allocation2 + $0x28] sm:$0xf0]  ;;  %v2903_v26 = vld [vmem:[%s4163_s0 + $0x70] sm:$0xff]  ;;  %v2546_v45 = vor.u32 %v2831_v15, %v2543_v27 }
 0x168   :  { %v541_v57 = vpop.f32.mrf.mxu3  ;;  %1338 = vmatmul.bf16.gmra.mxu1 %v3275_v18  ;;  %v2498_v10 = vor.u32 %v2819_v61, %v2495_v59  ;;  %v2817_v61 = vld [vmem:[#allocation2 + $0x14] sm:$0xf]  ;;  %v2487_v59 = vld [vmem:[#allocation2 + $0x18] sm:$0xf0]  ;;  %1710 = vmatpush.bf16.msrb.mxu2 %v2666_v19 }
 0x169   :  { %4226 = vst [vmem:[#allocation30_spill] sm:$0xff] %v3437_v9  ;;  %v542_v17 = vadd.f32 %v541_v57, %v3330_v6  ;;  %v640_v35 = vmax.f32 %v453_v53, 0.0  ;;  %v2559_v57 = vld [vmem:[#allocation2 + $0xa8] sm:$0xf0]  ;;  %v2833_v9 = vld [vmem:[#allocation2 + $0x94] sm:$0xf]  ;;  %v2490_v36 = vor.u32 %v2817_v61, %v2487_v59 }
 0x16a   :  { %v2562_v53 = vor.u32 %v2835_v34, %v2559_v57  ;;  %1537 = vmatpush.bf16.msra.mxu0 %v2498_v10  ;;  %v2551_v34 = vld [vmem:[#allocation2 + $0x98] sm:$0xf0]  ;;  %v2815_v57 = vld [vmem:[#allocation2 + $0x4] sm:$0xf]  ;;  %v2479_v10 = vld [vmem:[#allocation2 + $0x8] sm:$0xf0] }
 0x16b   :  { %v641_v14 = vmax.f32 %v542_v17, 0.0  ;;  %2457 = vmatmul.msk.bf16.gmra.mxu2 %vm189_vm0, %v2903_v26  ;;  %v3447_v41 = vpack.c.bf16 %v640_v35, %v636_v60 }
 0x16c   :  { %v1212_v32 = vpop.f32.mrf.mxu0  ;;  %1626 = vmatpush.bf16.msra.mxu1 %v2562_v53 }
 0x16d   :  { %2473 = vmatmul.msk.bf16.gmra.mxu3 %vm189_vm0, %v2903_v26  ;;  %v3450_v54 = vpack.c.bf16 %v641_v14, %v637_v63  ;;  %v1213_v56 = vadd.f32 %v1212_v32, %v3327_v62  ;;  %v1301_v17 = vpop.f32.mrf.mxu1  ;;  %v2877_v26 = vld [vmem:[#allocation2 + $0x1f4] sm:$0xf]  ;;  %v2554_v63 = vor.u32 %v2833_v9, %v2551_v34  ;;  %v2482_v32 = vor.u32 %v2815_v57, %v2479_v10 }
 0x16e   :  { %v455_v18 = vpop.f32.mrf.mxu2  ;;  %v2730_v14 = vor.u32 %v2877_v26, %v2727_v20  ;;  %1538 = vmatpush.bf16.msra.mxu0 %v2490_v36 }
 0x16f   :  { %4227 = vst [vmem:[#allocation31_spill] sm:$0xff] %v3450_v54  ;;  %v3453_v60 = vadd.f32 %v1301_v17, %v1213_v56  ;;  %v456_v56 = vadd.f32 %v455_v18, %v3325_v51 }
 0x170   :  { %v544_v35 = vpop.f32.mrf.mxu3  ;;  %1799 = vmatpush.bf16.msrb.mxu3 %v2730_v14  ;;  %1627 = vmatpush.bf16.msra.mxu1 %v2554_v63 }
 0x171   :  { %v545_v61 = vadd.f32 %v544_v35, %v3330_v6  ;;  %v644_v18 = vmax.f32 %v456_v56, 0.0  ;;  %v2904_v35 = vld [vmem:[%s4163_s0 + $0x78] sm:$0xff] }
 0x172   :  { %1539 = vmatpush.bf16.msra.mxu0 %v2482_v32 }
 0x173   :  { %v645_v14 = vmax.f32 %v545_v61, 0.0 }
 0x174   :  { %v1215_v53 = vpop.f32.mrf.mxu0  ;;  %1628 = vmatpush.bf16.msra.mxu1 %v2546_v45 }
 0x175   :  { %v1216_v17 = vadd.f32 %v1215_v53, %v3327_v62  ;;  %v1304_v19 = vpop.f32.mrf.mxu1 }
 0x176   :  { %v457_v20 = vpop.f32.mrf.mxu2 }
 0x177   :  { %v3458_v36 = vadd.f32 %v1304_v19, %v1216_v17  ;;  %v458_v9 = vadd.f32 %v457_v20, %v3325_v51  ;;  %1254 = vmatmul.bf16.gmra.mxu0 %v3293_v43 }
 0x178   :  { %v546_v59 = vpop.f32.mrf.mxu3  ;;  %1343 = vmatmul.bf16.gmra.mxu1 %v3297_v44 }
 0x179   :  { %v547_v26 = vadd.f32 %v546_v59, %v3330_v6  ;;  %v648_v34 = vmax.f32 %v458_v9, 0.0 }
 0x17b   :  { %v649_v63 = vmax.f32 %v547_v26, 0.0  ;;  %2458 = vmatmul.msk.bf16.gmra.mxu2 %vm189_vm0, %v2904_v35  ;;  %v3468_v45 = vpack.c.bf16 %v648_v34, %v644_v18 }
 0x17c   :  { %v1217_v57 = vpop.f32.mrf.mxu0 }
 0x17d   :  { %4228 = vst [vmem:[#allocation32_spill] sm:$0xff] %v3468_v45  ;;  %2474 = vmatmul.msk.bf16.gmra.mxu3 %vm189_vm0, %v2904_v35  ;;  %v3471_v10 = vpack.c.bf16 %v649_v63, %v645_v14  ;;  %v1218_v32 = vadd.f32 %v1217_v57, %v3327_v62  ;;  %v1306_v15 = vpop.f32.mrf.mxu1 }
 0x17e   :  { %v460_v27 = vpop.f32.mrf.mxu2 }
 0x17f   :  { %4229 = vst [vmem:[#allocation33_spill] sm:$0xff] %v3471_v10  ;;  %v3474_v53 = vadd.f32 %v1306_v15, %v1218_v32  ;;  %v461_v19 = vadd.f32 %v460_v27, %v3325_v51 }
 0x180   :  { %v549_v56 = vpop.f32.mrf.mxu3 }
 0x181   :  { %v550_v9 = vadd.f32 %v549_v56, %v3330_v6  ;;  %v652_v63 = vmax.f32 %v461_v19, 0.0  ;;  %v2859_v56 = vld [vmem:[#allocation2 + $0x164] sm:$0xf] }
 0x183   :  { %v653_v57 = vmax.f32 %v550_v9, 0.0 }
 0x184   :  { %v1220_v17 = vpop.f32.mrf.mxu0 }
 0x185   :  { %v1221_v61 = vadd.f32 %v1220_v17, %v3327_v62  ;;  %v1309_v20 = vpop.f32.mrf.mxu1  ;;  %v2655_v17 = vld [vmem:[#allocation2 + $0x168] sm:$0xf0] }
 0x186   :  { %v462_v59 = vpop.f32.mrf.mxu2 }
 0x187   :  { %v3479_v26 = vadd.f32 %v1309_v20, %v1221_v61  ;;  %v463_v18 = vadd.f32 %v462_v59, %v3325_v51  ;;  %1259 = vmatmul.bf16.gmra.mxu0 %v3315_v47 }
 0x188   :  { %v551_v34 = vpop.f32.mrf.mxu3  ;;  %1348 = vmatmul.bf16.gmra.mxu1 %v3319_v50 }
 0x189   :  { %v552_v14 = vadd.f32 %v551_v34, %v3330_v6  ;;  %v656_v35 = vmax.f32 %v463_v18, 0.0  ;;  %v2658_v34 = vor.u32 %v2859_v56, %v2655_v17  ;;  %v2875_v18 = vld [vmem:[#allocation2 + $0x1e4] sm:$0xf] }
 0x18b   :  { %v657_v32 = vmax.f32 %v552_v14, 0.0  ;;  %1362 = vmatmul.bf16.vlgmr.msra.gmra.mxu2 %v3341_v38  ;;  %v3486_v15 = vpack.c.bf16 %v656_v35, %v652_v63  ;;  %v2719_v14 = vld [vmem:[#allocation2 + $0x1e8] sm:$0xf0] }
 0x18c   :  { %v1222_v27 = vpop.f32.mrf.mxu0  ;;  %1711 = vmatpush.bf16.msrb.mxu2 %v2658_v34  ;;  %v2722_v63 = vor.u32 %v2875_v18, %v2719_v14 }
 0x18d   :  { %1451 = vmatmul.bf16.vlgmr.msra.gmra.mxu3 %v3345_v39  ;;  %v3489_v61 = vpack.c.bf16 %v657_v32, %v653_v57  ;;  %v1223_v20 = vadd.f32 %v1222_v27, %v3327_v62  ;;  %v1311_v59 = vpop.f32.mrf.mxu1 }
 0x18e   :  { %v465_v50 = vpop.f32.mrf.mxu2  ;;  %1800 = vmatpush.bf16.msrb.mxu3 %v2722_v63 }
 0x18f   :  { %v3492_v19 = vadd.f32 %v1311_v59, %v1223_v20  ;;  %v466_v39 = vadd.f32 %v465_v50, %v3325_v51 }
 0x190   :  { %v554_v9 = vpop.f32.mrf.mxu3 }
 0x191   :  { %v555_v32 = vadd.f32 %v554_v9, %v3330_v6  ;;  %v660_v59 = vmax.f32 %v466_v39, 0.0 }
 0x193   :  { %v661_v50 = vmax.f32 %v555_v32, 0.0 }
 0x194   :  { %v1225_v35 = vpop.f32.mrf.mxu0 }
 0x195   :  { %v1226_v38 = vadd.f32 %v1225_v35, %v3327_v62  ;;  %v1314_v57 = vpop.f32.mrf.mxu1 }
 0x196   :  { %v467_v27 = vpop.f32.mrf.mxu2 }
 0x197   :  { %v3497_v47 = vadd.f32 %v1314_v57, %v1226_v38  ;;  %v468_v56 = vadd.f32 %v467_v27, %v3325_v51  ;;  %1540 = vmatmul.bf16.vlgmr.msra.gmra.mxu0 %v3150_v52 }
 0x198   :  { %v556_v17 = vpop.f32.mrf.mxu3  ;;  %1629 = vmatmul.bf16.vlgmr.msra.gmra.mxu1 %v3153_v55 }
 0x199   :  { %v557_v20 = vadd.f32 %v556_v17, %v3330_v6  ;;  %v664_v34 = vmax.f32 %v468_v56, 0.0 }
 0x19b   :  { %v665_v18 = vmax.f32 %v557_v20, 0.0  ;;  %1367 = vmatmul.bf16.gmra.mxu2 %v3363_v49  ;;  %v3504_v14 = vpack.c.bf16 %v664_v34, %v660_v59 }
 0x19c   :  { %v1227_v38 = vpop.f32.mrf.mxu0 }
 0x19d   :  { %1456 = vmatmul.bf16.gmra.mxu3 %v3367_v58  ;;  %v3507_v9 = vpack.c.bf16 %v665_v18, %v661_v50  ;;  %v1228_v63 = vadd.f32 %v1227_v38, %v3327_v62  ;;  %v1316_v52 = vpop.f32.mrf.mxu1 }
 0x19e   :  { %v470_v35 = vpop.f32.mrf.mxu2 }
 0x19f   :  { %v3510_v57 = vadd.f32 %v1316_v52, %v1228_v63  ;;  %v471_v32 = vadd.f32 %v470_v35, %v3325_v51 }
 0x1a0   :  { %v559_v55 = vpop.f32.mrf.mxu3 }
 0x1a1   :  { %v560_v17 = vadd.f32 %v559_v55, %v3330_v6  ;;  %v668_v38 = vmax.f32 %v471_v32, 0.0 }
 0x1a3   :  { %v669_v52 = vmax.f32 %v560_v17, 0.0 }
 0x1a4   :  { %v1230_v39 = vpop.f32.mrf.mxu0 }
 0x1a5   :  { %v1231_v27 = vadd.f32 %v1230_v39, %v3327_v62  ;;  %v1319_v56 = vpop.f32.mrf.mxu1 }
 0x1a6   :  { %v472_v20 = vpop.f32.mrf.mxu2 }
 0x1a7   :  { %v3515_v59 = vadd.f32 %v1319_v56, %v1231_v27  ;;  %v473_v34 = vadd.f32 %v472_v20, %v3325_v51  ;;  %1545 = vmatmul.bf16.gmra.mxu0 %v3172_v24  ;;  %v2857_v27 = vld [vmem:[#allocation2 + $0x154] sm:$0xf]  ;;  %v2647_v56 = vld [vmem:[#allocation2 + $0x158] sm:$0xf0] }
 0x1a8   :  { %v561_v50 = vpop.f32.mrf.mxu3  ;;  %1634 = vmatmul.bf16.gmra.mxu1 %v3175_v30 }
 0x1a9   :  { %4230 = vst [vmem:[#allocation34_spill] sm:$0xff] %v3515_v59  ;;  %v562_v18 = vadd.f32 %v561_v50, %v3330_v6  ;;  %v672_v63 = vmax.f32 %v473_v34, 0.0  ;;  %v2650_v59 = vor.u32 %v2857_v27, %v2647_v56  ;;  %v2873_v34 = vld [vmem:[#allocation2 + $0x1d4] sm:$0xf] }
 0x1ab   :  { %v673_v35 = vmax.f32 %v562_v18, 0.0  ;;  %1372 = vmatmul.bf16.gmra.mxu2 %v3383_v3  ;;  %v3522_v39 = vpack.c.bf16 %v672_v63, %v668_v38  ;;  %v2711_v18 = vld [vmem:[#allocation2 + $0x1d8] sm:$0xf0] }
 0x1ac   :  { %v1232_v55 = vpop.f32.mrf.mxu0  ;;  %1712 = vmatpush.bf16.msrb.mxu2 %v2650_v59  ;;  %v2714_v38 = vor.u32 %v2873_v34, %v2711_v18 }
 0x1ad   :  { %1461 = vmatmul.bf16.gmra.mxu3 %v3387_v8  ;;  %v3525_v20 = vpack.c.bf16 %v673_v35, %v669_v52  ;;  %v1233_v24 = vadd.f32 %v1232_v55, %v3327_v62  ;;  %v1321_v50 = vpop.f32.mrf.mxu1 }
 0x1ae   :  { %v475_v30 = vpop.f32.mrf.mxu2  ;;  %1801 = vmatpush.bf16.msrb.mxu3 %v2714_v38 }
 0x1af   :  { %v3528_v32 = vadd.f32 %v1321_v50, %v1233_v24  ;;  %v476_v8 = vadd.f32 %v475_v30, %v3325_v51 }
 0x1b0   :  { %v564_v17 = vpop.f32.mrf.mxu3 }
 0x1b1   :  { %v565_v35 = vadd.f32 %v564_v17, %v3330_v6  ;;  %v676_v24 = vmax.f32 %v476_v8, 0.0 }
 0x1b3   :  { %v677_v30 = vmax.f32 %v565_v35, 0.0 }
 0x1b4   :  { %v1235_v63 = vpop.f32.mrf.mxu0 }
 0x1b5   :  { %v1236_v3 = vadd.f32 %v1235_v63, %v3327_v62  ;;  %v1324_v52 = vpop.f32.mrf.mxu1 }
 0x1b6   :  { %v477_v55 = vpop.f32.mrf.mxu2 }
 0x1b7   :  { %v3533_v58 = vadd.f32 %v1324_v52, %v1236_v3  ;;  %v478_v27 = vadd.f32 %v477_v55, %v3325_v51  ;;  %1550 = vmatmul.bf16.gmra.mxu0 %v3194_v0 }
 0x1b8   :  { %v566_v56 = vpop.f32.mrf.mxu3  ;;  %1639 = vmatmul.bf16.gmra.mxu1 %v3197_v7 }
 0x1b9   :  { %v567_v59 = vadd.f32 %v566_v56, %v3330_v6  ;;  %v680_v50 = vmax.f32 %v478_v27, 0.0 }
 0x1bb   :  { %v681_v34 = vmax.f32 %v567_v59, 0.0  ;;  %1377 = vmatmul.bf16.gmra.mxu2 %v3405_v5  ;;  %v3540_v18 = vpack.c.bf16 %v680_v50, %v676_v24 }
 0x1bc   :  { %v1237_v3 = vpop.f32.mrf.mxu0 }
 0x1bd   :  { %4231 = vst [vmem:[#allocation35_spill] sm:$0xff] %v3540_v18  ;;  %1466 = vmatmul.bf16.gmra.mxu3 %v3408_v16  ;;  %v3543_v17 = vpack.c.bf16 %v681_v34, %v677_v30  ;;  %v1238_v38 = vadd.f32 %v1237_v3, %v3327_v62  ;;  %v1326_v0 = vpop.f32.mrf.mxu1 }
 0x1be   :  { %v480_v63 = vpop.f32.mrf.mxu2 }
 0x1bf   :  { %4232 = vst [vmem:[#allocation36_spill] sm:$0xff] %v3543_v17  ;;  %v3546_v52 = vadd.f32 %v1326_v0, %v1238_v38  ;;  %v481_v35 = vadd.f32 %v480_v63, %v3325_v51 }
 0x1c0   :  { %v569_v7 = vpop.f32.mrf.mxu3 }
 0x1c1   :  { %v570_v56 = vadd.f32 %v569_v7, %v3330_v6  ;;  %v684_v3 = vmax.f32 %v481_v35, 0.0 }
 0x1c3   :  { %v685_v0 = vmax.f32 %v570_v56, 0.0 }
 0x1c4   :  { %v1240_v8 = vpop.f32.mrf.mxu0 }
 0x1c5   :  { %v1241_v55 = vadd.f32 %v1240_v8, %v3327_v62  ;;  %v1329_v27 = vpop.f32.mrf.mxu1 }
 0x1c6   :  { %v482_v59 = vpop.f32.mrf.mxu2 }
 0x1c7   :  { %v3551_v24 = vadd.f32 %v1329_v27, %v1241_v55  ;;  %v483_v50 = vadd.f32 %v482_v59, %v3325_v51  ;;  %1555 = vmatmul.bf16.gmra.mxu0 %v3216_v46  ;;  %v2855_v55 = vld [vmem:[#allocation2 + $0x144] sm:$0xf]  ;;  %v2639_v27 = vld [vmem:[#allocation2 + $0x148] sm:$0xf0] }
 0x1c8   :  { %v571_v30 = vpop.f32.mrf.mxu3  ;;  %1644 = vmatmul.bf16.gmra.mxu1 %v3219_v48 }
 0x1c9   :  { %4233 = vst [vmem:[#allocation37_spill] sm:$0xff] %v3551_v24  ;;  %v572_v34 = vadd.f32 %v571_v30, %v3330_v6  ;;  %v688_v38 = vmax.f32 %v483_v50, 0.0  ;;  %v2642_v24 = vor.u32 %v2855_v55, %v2639_v27  ;;  %v2871_v50 = vld [vmem:[#allocation2 + $0x1c4] sm:$0xf] }
 0x1cb   :  { %v689_v63 = vmax.f32 %v572_v34, 0.0  ;;  %1382 = vmatmul.bf16.gmra.mxu2 %v3426_v25  ;;  %v3558_v8 = vpack.c.bf16 %v688_v38, %v684_v3  ;;  %v2703_v34 = vld [vmem:[#allocation2 + $0x1c8] sm:$0xf0] }
 0x1cc   :  { %v1242_v7 = vpop.f32.mrf.mxu0  ;;  %1713 = vmatpush.bf16.msrb.mxu2 %v2642_v24  ;;  %v2706_v3 = vor.u32 %v2871_v50, %v2703_v34 }
 0x1cd   :  { %4234 = vst [vmem:[#allocation38_spill] sm:$0xff] %v3558_v8  ;;  %1471 = vmatmul.bf16.gmra.mxu3 %v3429_v33  ;;  %v3561_v59 = vpack.c.bf16 %v689_v63, %v685_v0  ;;  %v1243_v46 = vadd.f32 %v1242_v7, %v3327_v62  ;;  %v1331_v30 = vpop.f32.mrf.mxu1 }
 0x1ce   :  { %v485_v48 = vpop.f32.mrf.mxu2  ;;  %1802 = vmatpush.bf16.msrb.mxu3 %v2706_v3 }
 0x1cf   :  { %4235 = vst [vmem:[#allocation39_spill] sm:$0xff] %v3561_v59  ;;  %v3564_v35 = vadd.f32 %v1331_v30, %v1243_v46  ;;  %v486_v33 = vadd.f32 %v485_v48, %v3325_v51 }
 0x1d0   :  { %v574_v56 = vpop.f32.mrf.mxu3 }
 0x1d1   :  { %v575_v63 = vadd.f32 %v574_v56, %v3330_v6  ;;  %v692_v46 = vmax.f32 %v486_v33, 0.0 }
 0x1d3   :  { %v693_v48 = vmax.f32 %v575_v63, 0.0 }
 0x1d4   :  { %v1245_v38 = vpop.f32.mrf.mxu0 }
 0x1d5   :  { %v1246_v25 = vadd.f32 %v1245_v38, %v3327_v62  ;;  %v1334_v0 = vpop.f32.mrf.mxu1 }
 0x1d6   :  { %v487_v7 = vpop.f32.mrf.mxu2 }
 0x1d7   :  { %v3569_v16 = vadd.f32 %v1334_v0, %v1246_v25  ;;  %v488_v55 = vadd.f32 %v487_v7, %v3325_v51  ;;  %1560 = vmatmul.bf16.gmra.mxu0 %v3238_v37 }
 0x1d8   :  { %v576_v27 = vpop.f32.mrf.mxu3  ;;  %1649 = vmatmul.bf16.gmra.mxu1 %v3241_v40 }
 0x1d9   :  { %v577_v24 = vadd.f32 %v576_v27, %v3330_v6  ;;  %v696_v30 = vmax.f32 %v488_v55, 0.0 }
 0x1db   :  { %v697_v50 = vmax.f32 %v577_v24, 0.0  ;;  %1387 = vmatmul.bf16.gmra.mxu2 %v3447_v41  ;;  %v3576_v34 = vpack.c.bf16 %v696_v30, %v692_v46 }
 0x1dc   :  { %v1247_v25 = vpop.f32.mrf.mxu0 }
 0x1dd   :  { %4236 = vst [vmem:[#allocation40_spill] sm:$0xff] %v3576_v34  ;;  %1476 = vmatmul.bf16.gmra.mxu3 %v3450_v54  ;;  %v3579_v56 = vpack.c.bf16 %v697_v50, %v693_v48  ;;  %v1248_v3 = vadd.f32 %v1247_v25, %v3327_v62  ;;  %v1336_v37 = vpop.f32.mrf.mxu1 }
 0x1de   :  { %v490_v38 = vpop.f32.mrf.mxu2 }
 0x1df   :  { %4237 = vst [vmem:[#allocation41_spill] sm:$0xff] %v3579_v56  ;;  %v3582_v0 = vadd.f32 %v1336_v37, %v1248_v3  ;;  %v491_v63 = vadd.f32 %v490_v38, %v3325_v51 }
 0x1e0   :  { %v579_v40 = vpop.f32.mrf.mxu3 }
 0x1e1   :  { %v580_v27 = vadd.f32 %v579_v40, %v3330_v6  ;;  %v700_v25 = vmax.f32 %v491_v63, 0.0 }
 0x1e3   :  { %v701_v37 = vmax.f32 %v580_v27, 0.0 }
 0x1e4   :  { %v1250_v33 = vpop.f32.mrf.mxu0 }
 0x1e5   :  { %v1251_v7 = vadd.f32 %v1250_v33, %v3327_v62  ;;  %v1339_v55 = vpop.f32.mrf.mxu1 }
 0x1e6   :  { %v492_v24 = vpop.f32.mrf.mxu2 }
 0x1e7   :  { %v3587_v46 = vadd.f32 %v1339_v55, %v1251_v7  ;;  %v493_v30 = vadd.f32 %v492_v24, %v3325_v51  ;;  %1565 = vmatmul.bf16.gmra.mxu0 %v3260_v12  ;;  %v2853_v7 = vld [vmem:[#allocation2 + $0x134] sm:$0xf]  ;;  %v2631_v55 = vld [vmem:[#allocation2 + $0x138] sm:$0xf0] }
 0x1e8   :  { %v581_v48 = vpop.f32.mrf.mxu3  ;;  %1654 = vmatmul.bf16.gmra.mxu1 %v3263_v22 }
 0x1e9   :  { %4238 = vst [vmem:[#allocation42_spill] sm:$0xff] %v3587_v46  ;;  %v582_v50 = vadd.f32 %v581_v48, %v3330_v6  ;;  %v704_v3 = vmax.f32 %v493_v30, 0.0  ;;  %v2634_v46 = vor.u32 %v2853_v7, %v2631_v55  ;;  %v2869_v30 = vld [vmem:[#allocation2 + $0x1b4] sm:$0xf] }
 0x1eb   :  { %v705_v38 = vmax.f32 %v582_v50, 0.0  ;;  %1392 = vmatmul.bf16.gmra.mxu2 %v3468_v45  ;;  %v3594_v33 = vpack.c.bf16 %v704_v3, %v700_v25  ;;  %v2695_v50 = vld [vmem:[#allocation2 + $0x1b8] sm:$0xf0] }
 0x1ec   :  { %v1252_v40 = vpop.f32.mrf.mxu0  ;;  %1714 = vmatpush.bf16.msrb.mxu2 %v2634_v46  ;;  %v2698_v25 = vor.u32 %v2869_v30, %v2695_v50 }
 0x1ed   :  { %1481 = vmatmul.bf16.gmra.mxu3 %v3471_v10  ;;  %v3597_v24 = vpack.c.bf16 %v705_v38, %v701_v37  ;;  %v1253_v12 = vadd.f32 %v1252_v40, %v3327_v62  ;;  %v1341_v48 = vpop.f32.mrf.mxu1 }
 0x1ee   :  { %v495_v22 = vpop.f32.mrf.mxu2  ;;  %1803 = vmatpush.bf16.msrb.mxu3 %v2698_v25 }
 0x1ef   :  { %v3600_v63 = vadd.f32 %v1341_v48, %v1253_v12  ;;  %v496_v10 = vadd.f32 %v495_v22, %v3325_v51 }
 0x1f0   :  { %v584_v27 = vpop.f32.mrf.mxu3 }
 0x1f1   :  { %v585_v38 = vadd.f32 %v584_v27, %v3330_v6  ;;  %v708_v12 = vmax.f32 %v496_v10, 0.0  ;;  %v2886_v10 = vld [vmem:[%s4168_s5 + $0x38] sm:$0xff] }
 0x1f2   :  { %2116 = vmatpush.bf16.msrb.mxu0 %v2886_v10 }
 0x1f3   :  { %v709_v22 = vmax.f32 %v585_v38, 0.0  ;;  %v2894_v38 = vld [vmem:[%s4168_s5 + $0x78] sm:$0xff] }
 0x1f4   :  { %v1255_v3 = vpop.f32.mrf.mxu0  ;;  %2205 = vmatpush.bf16.msrb.mxu1 %v2894_v38 }
 0x1f5   :  { %v1256_v45 = vadd.f32 %v1255_v3, %v3327_v62  ;;  %v1344_v37 = vpop.f32.mrf.mxu1 }
 0x1f6   :  { %v497_v40 = vpop.f32.mrf.mxu2 }
 0x1f7   :  { %v3605_v54 = vadd.f32 %v1344_v37, %v1256_v45  ;;  %v498_v7 = vadd.f32 %v497_v40, %v3325_v51  ;;  %1570 = vmatmul.bf16.gmra.mxu0 %v3282_v11 }
 0x1f8   :  { %v586_v55 = vpop.f32.mrf.mxu3  ;;  %1659 = vmatmul.bf16.gmra.mxu1 %v3285_v21 }
 0x1f9   :  { %v587_v46 = vadd.f32 %v586_v55, %v3330_v6  ;;  %v712_v48 = vmax.f32 %v498_v7, 0.0 }
 0x1fb   :  { %v713_v30 = vmax.f32 %v587_v46, 0.0  ;;  %1397 = vmatmul.bf16.gmra.mxu2 %v3486_v15  ;;  %v3612_v50 = vpack.c.bf16 %v712_v48, %v708_v12 }
 0x1fc   :  { %v1257_v45 = vpop.f32.mrf.mxu0 }
 0x1fd   :  { %1486 = vmatmul.bf16.gmra.mxu3 %v3489_v61  ;;  %v3615_v27 = vpack.c.bf16 %v713_v30, %v709_v22  ;;  %v1258_v25 = vadd.f32 %v1257_v45, %v3327_v62  ;;  %v1346_v11 = vpop.f32.mrf.mxu1 }
 0x1fe   :  { %v500_v3 = vpop.f32.mrf.mxu2 }
 0x1ff   :  { %v3618_v37 = vadd.f32 %v1346_v11, %v1258_v25  ;;  %v501_v7 = vadd.f32 %v500_v3, %v3325_v51 }
 0x200   :  { %v589_v21 = vpop.f32.mrf.mxu3 }
 0x201   :  { %v590_v12 = vadd.f32 %v589_v21, %v3330_v6  ;;  %v716_v11 = vmax.f32 %v501_v7, 0.0 }
 0x203   :  { %v717_v10 = vmax.f32 %v590_v12, 0.0 }
 0x204   :  { %v1260_v40 = vpop.f32.mrf.mxu0 }
 0x205   :  { %v1261_v55 = vadd.f32 %v1260_v40, %v3327_v62  ;;  %v1349_v46 = vpop.f32.mrf.mxu1 }
 0x206   :  { %v502_v48 = vpop.f32.mrf.mxu2 }
 0x207   :  { %v3629_v22 = vadd.f32 %v1349_v46, %v1261_v55  ;;  %v503_v30 = vadd.f32 %v502_v48, %v3325_v51  ;;  %1575 = vmatmul.bf16.gmra.mxu0 %v3304_v13  ;;  %v2851_v55 = vld [vmem:[#allocation2 + $0x124] sm:$0xf]  ;;  %v2623_v51 = vld [vmem:[#allocation2 + $0x128] sm:$0xf0] }
 0x208   :  { %v591_v45 = vpop.f32.mrf.mxu3  ;;  %1664 = vmatmul.bf16.gmra.mxu1 %v3307_v29  ;;  %v2626_v48 = vor.u32 %v2851_v55, %v2623_v51 }
 0x209   :  { %v592_v25 = vadd.f32 %v591_v45, %v3330_v6  ;;  %v720_v3 = vmax.f32 %v503_v30, 0.0  ;;  %v2867_v45 = vld [vmem:[#allocation2 + $0x1a4] sm:$0xf] }
 0x20a   :  { %1715 = vmatpush.bf16.msrb.mxu2 %v2626_v48 }
 0x20b   :  { %v721_v40 = vmax.f32 %v592_v25, 0.0  ;;  %1402 = vmatmul.bf16.gmra.mxu2 %v3504_v14  ;;  %v3636_v38 = vpack.c.bf16 %v720_v3, %v716_v11  ;;  %v2687_v25 = vld [vmem:[#allocation2 + $0x1a8] sm:$0xf0] }
 0x20c   :  { %v1262_v21 = vpop.f32.mrf.mxu0  ;;  %v2690_v11 = vor.u32 %v2867_v45, %v2687_v25 }
 0x20d   :  { %4239 = vst [vmem:[#allocation43_spill] sm:$0xff] %v3636_v38  ;;  %1491 = vmatmul.bf16.gmra.mxu3 %v3507_v9  ;;  %v3639_v46 = vpack.c.bf16 %v721_v40, %v717_v10  ;;  %v1263_v13 = vadd.f32 %v1262_v21, %v3327_v62  ;;  %v1351_v6 = vpop.f32.mrf.mxu1  ;;  %v2905_v10 = vld [vmem:[%s4167_s4] sm:$0x3] }
 0x20e   :  { %v1363_v29 = vpop.f32.mrf.mxu2  ;;  %v3648_v40 = vperm.slane %v2905_v10, 1  ;;  %1804 = vmatpush.bf16.msrb.mxu3 %v2690_v11 }
 0x20f   :  { %4240 = vst [vmem:[#allocation44_spill] sm:$0xff] %v3639_v46  ;;  %v3642_v7 = vadd.f32 %v1351_v6, %v1263_v13  ;;  %v1364_v12 = vadd.f32 %v1363_v29, %v3335_v28 }
 0x210   :  { %v1452_v30 = vpop.f32.mrf.mxu3 }
 0x211   :  { %v1453_v3 = vadd.f32 %v1452_v30, %v1364_v12 }
 0x213   :  { %v1888_v29 = vmax.f32 %v1453_v3, 0.0 }
 0x214   :  { %v1541_v62 = vpop.f32.mrf.mxu0 }
 0x215   :  { %v1542_v21 = vadd.f32 %v1541_v62, %v3648_v40  ;;  %v1630_v55 = vpop.f32.mrf.mxu1 }
 0x216   :  { %v1365_v51 = vpop.f32.mrf.mxu2 }
 0x217   :  { %v3651_v13 = vadd.f32 %v1630_v55, %v1542_v21  ;;  %v1366_v28 = vadd.f32 %v1365_v51, %v3350_v31  ;;  %1580 = vmatmul.bf16.gmra.mxu0 %v3161_v1  ;;  %v2893_v21 = vld [vmem:[%s4168_s5 + $0x70] sm:$0xff] }
 0x218   :  { %v1454_v6 = vpop.f32.mrf.mxu3  ;;  %1669 = vmatmul.bf16.gmra.mxu1 %v3165_v2  ;;  %v2885_v2 = vld [vmem:[%s4168_s5 + $0x30] sm:$0xff] }
 0x219   :  { %v1455_v48 = vadd.f32 %v1454_v6, %v1366_v28  ;;  %2117 = vmatpush.bf16.msrb.mxu0 %v2885_v2  ;;  %2206 = vmatpush.bf16.msrb.mxu1 %v2893_v21 }
 0x21b   :  { %v1890_v12 = vmax.f32 %v1455_v48, 0.0  ;;  %1407 = vmatmul.bf16.gmra.mxu2 %v3522_v39 }
 0x21c   :  { %v1543_v30 = vpop.f32.mrf.mxu0 }
 0x21d   :  { %1496 = vmatmul.bf16.gmra.mxu3 %v3525_v20  ;;  %v3658_v45 = vpack.c.bf16 %v1890_v12, %v1888_v29  ;;  %v1544_v25 = vadd.f32 %v1543_v30, %v3648_v40  ;;  %v1632_v11 = vpop.f32.mrf.mxu1  ;;  %v4242_v12 = vld [vmem:[#allocation5_spill] sm:$0xff] }
 0x21e   :  { %v1368_v10 = vpop.f32.mrf.mxu2 }
 0x21f   :  { %v3661_v31 = vadd.f32 %v1632_v11, %v1544_v25  ;;  %v1369_v1 = vadd.f32 %v1368_v10, %v3355_v23 }
 0x220   :  { %v1457_v62 = vpop.f32.mrf.mxu3 }
 0x221   :  { %v1458_v3 = vadd.f32 %v1457_v62, %v1369_v1  ;;  %v2849_v1 = vld [vmem:[#allocation2 + $0x114] sm:$0xf]  ;;  %v2615_v62 = vld [vmem:[#allocation2 + $0x118] sm:$0xf0] }
 0x223   :  { %v1892_v25 = vmax.f32 %v1458_v3, 0.0 }
 0x224   :  { %v1546_v55 = vpop.f32.mrf.mxu0 }
 0x225   :  { %v1547_v51 = vadd.f32 %v1546_v55, %v3648_v40  ;;  %v1635_v28 = vpop.f32.mrf.mxu1  ;;  %v2618_v55 = vor.u32 %v2849_v1, %v2615_v62 }
 0x226   :  { %v1370_v6 = vpop.f32.mrf.mxu2 }
 0x227   :  { %v3671_v48 = vadd.f32 %v1635_v28, %v1547_v51  ;;  %v1371_v23 = vadd.f32 %v1370_v6, %v3370_v4  ;;  %1585 = vmatmul.bf16.gmra.mxu0 %v3183_v42  ;;  %v4243_v28 = vld [vmem:[#allocation19_spill] sm:$0xff]  ;;  %1716 = vmatpush.bf16.msrb.mxu2 %v2618_v55 }
 0x228   :  { %v1459_v29 = vpop.f32.mrf.mxu3  ;;  %1674 = vmatmul.bf16.gmra.mxu1 %v4242_v12 }
 0x229   :  { %4241 = vst [vmem:[#allocation45_spill] sm:$0xff] %v3671_v48  ;;  %v1460_v30 = vadd.f32 %v1459_v29, %v1371_v23  ;;  %v2865_v23 = vld [vmem:[#allocation2 + $0x194] sm:$0xf]  ;;  %v2679_v29 = vld [vmem:[#allocation2 + $0x198] sm:$0xf0] }
 0x22a   :  { %v2682_v12 = vor.u32 %v2865_v23, %v2679_v29  ;;  %v4248_v29 = vld [vmem:[#allocation23_spill] sm:$0xff] }
 0x22b   :  { %v1894_v11 = vmax.f32 %v1460_v30, 0.0  ;;  %1412 = vmatmul.bf16.gmra.mxu2 %v3540_v18 }
 0x22c   :  { %v1548_v10 = vpop.f32.mrf.mxu0  ;;  %1805 = vmatpush.bf16.msrb.mxu3 %v2682_v12 }
 0x22d   :  { %1501 = vmatmul.bf16.gmra.mxu3 %v3543_v17  ;;  %v1549_v2 = vadd.f32 %v1548_v10, %v3648_v40  ;;  %v1637_v21 = vpop.f32.mrf.mxu1  ;;  %v3679_v4 = vpack.c.bf16 %v1894_v11, %v1892_v25  ;;  %v4244_v25 = vld [vmem:[#allocation22_spill] sm:$0xff] }
 0x22e   :  { %v1373_v51 = vpop.f32.mrf.mxu2 }
 0x22f   :  { %v3681_v42 = vadd.f32 %v1637_v21, %v1549_v2  ;;  %v1374_v6 = vadd.f32 %v1373_v51, %v4243_v28  ;;  %v4245_v2 = vld [vmem:[#allocation6_spill] sm:$0xff]  ;;  %v4246_v21 = vld [vmem:[#allocation7_spill] sm:$0xff] }
 0x230   :  { %v1462_v3 = vpop.f32.mrf.mxu3 }
 0x231   :  { %v1463_v30 = vadd.f32 %v1462_v3, %v1374_v6 }
 0x233   :  { %v1896_v51 = vmax.f32 %v1463_v30, 0.0  ;;  %v2884_v30 = vld [vmem:[%s4168_s5 + $0x28] sm:$0xff] }
 0x234   :  { %v1551_v17 = vpop.f32.mrf.mxu0  ;;  %2118 = vmatpush.bf16.msrb.mxu0 %v2884_v30 }
 0x235   :  { %v1552_v18 = vadd.f32 %v1551_v17, %v3648_v40  ;;  %v1640_v10 = vpop.f32.mrf.mxu1 }
 0x236   :  { %v1375_v48 = vpop.f32.mrf.mxu2 }
 0x237   :  { %v3685_v1 = vadd.f32 %v1640_v10, %v1552_v18  ;;  %v1376_v11 = vadd.f32 %v1375_v48, %v4244_v25  ;;  %1590 = vmatmul.bf16.gmra.mxu0 %v4245_v2 }
 0x238   :  { %v1464_v62 = vpop.f32.mrf.mxu3  ;;  %1679 = vmatmul.bf16.gmra.mxu1 %v4246_v21 }
 0x239   :  { %v1465_v55 = vadd.f32 %v1464_v62, %v1376_v11  ;;  %v2892_v11 = vld [vmem:[%s4168_s5 + $0x68] sm:$0xff] }
 0x23a   :  { %2207 = vmatpush.bf16.msrb.mxu1 %v2892_v11  ;;  %v2607_v11 = vld [vmem:[#allocation2 + $0x108] sm:$0xf0] }
 0x23b   :  { %v1898_v28 = vmax.f32 %v1465_v55, 0.0  ;;  %1417 = vmatmul.bf16.gmra.mxu2 %v3558_v8 }
 0x23c   :  { %v1553_v6 = vpop.f32.mrf.mxu0 }
 0x23d   :  { %1506 = vmatmul.bf16.gmra.mxu3 %v3561_v59  ;;  %v1554_v17 = vadd.f32 %v1553_v6, %v3648_v40  ;;  %v1642_v3 = vpop.f32.mrf.mxu1  ;;  %v3693_v18 = vpack.c.bf16 %v1898_v28, %v1896_v51  ;;  %v4250_v28 = vld [vmem:[#allocation25_spill] sm:$0xff] }
 0x23e   :  { %v1378_v23 = vpop.f32.mrf.mxu2 }
 0x23f   :  { %v3695_v48 = vadd.f32 %v1642_v3, %v1554_v17  ;;  %v1379_v12 = vadd.f32 %v1378_v23, %v4248_v29  ;;  %v4251_v3 = vld [vmem:[#allocation8_spill] sm:$0xff]  ;;  %v4252_v23 = vld [vmem:[#allocation9_spill] sm:$0xff] }
 0x240   :  { %v1467_v10 = vpop.f32.mrf.mxu3 }
 0x241   :  { %4247 = vst [vmem:[#allocation5_spill] sm:$0xff] %v3695_v48  ;;  %v1468_v25 = vadd.f32 %v1467_v10, %v1379_v12 }
 0x243   :  { %v1900_v12 = vmax.f32 %v1468_v25, 0.0 }
 0x244   :  { %v1556_v62 = vpop.f32.mrf.mxu0 }
 0x245   :  { %v1557_v2 = vadd.f32 %v1556_v62, %v3648_v40  ;;  %v1645_v21 = vpop.f32.mrf.mxu1  ;;  %v2847_v62 = vld [vmem:[#allocation2 + $0x104] sm:$0xf] }
 0x246   :  { %v1380_v55 = vpop.f32.mrf.mxu2 }
 0x247   :  { %v3705_v51 = vadd.f32 %v1645_v21, %v1557_v2  ;;  %v1381_v6 = vadd.f32 %v1380_v55, %v4250_v28  ;;  %1595 = vmatmul.bf16.gmra.mxu0 %v4251_v3 }
 0x248   :  { %v1469_v17 = vpop.f32.mrf.mxu3  ;;  %1684 = vmatmul.bf16.gmra.mxu1 %v4252_v23  ;;  %v4253_v23 = vld [vmem:[#allocation26_spill] sm:$0xff] }
 0x249   :  { %4249 = vst [vmem:[#allocation19_spill] sm:$0xff] %v3705_v51  ;;  %v1470_v29 = vadd.f32 %v1469_v17, %v1381_v6  ;;  %v2610_v51 = vor.u32 %v2847_v62, %v2607_v11  ;;  %v2863_v17 = vld [vmem:[#allocation2 + $0x184] sm:$0xf] }
 0x24b   :  { %v1902_v10 = vmax.f32 %v1470_v29, 0.0  ;;  %1422 = vmatmul.bf16.gmra.mxu2 %v3576_v34  ;;  %v2671_v29 = vld [vmem:[#allocation2 + $0x188] sm:$0xf0] }
 0x24c   :  { %v1558_v30 = vpop.f32.mrf.mxu0  ;;  %1717 = vmatpush.bf16.msrb.mxu2 %v2610_v51  ;;  %v2674_v34 = vor.u32 %v2863_v17, %v2671_v29  ;;  %v2883_v29 = vld [vmem:[%s4168_s5 + $0x20] sm:$0xff] }
 0x24d   :  { %1511 = vmatmul.bf16.gmra.mxu3 %v3579_v56  ;;  %v1559_v2 = vadd.f32 %v1558_v30, %v3648_v40  ;;  %v1647_v21 = vpop.f32.mrf.mxu1  ;;  %v3713_v55 = vpack.c.bf16 %v1902_v10, %v1900_v12  ;;  %v4254_v12 = vld [vmem:[#allocation29_spill] sm:$0xff]  ;;  %2119 = vmatpush.bf16.msrb.mxu0 %v2883_v29 }
 0x24e   :  { %v1383_v28 = vpop.f32.mrf.mxu2  ;;  %1806 = vmatpush.bf16.msrb.mxu3 %v2674_v34 }
 0x24f   :  { %v3715_v3 = vadd.f32 %v1647_v21, %v1559_v2  ;;  %v1384_v6 = vadd.f32 %v1383_v28, %v4253_v23  ;;  %v4255_v2 = vld [vmem:[#allocation10_spill] sm:$0xff]  ;;  %v4256_v21 = vld [vmem:[#allocation11_spill] sm:$0xff] }
 0x250   :  { %v1472_v25 = vpop.f32.mrf.mxu3 }
 0x251   :  { %v1473_v56 = vadd.f32 %v1472_v25, %v1384_v6 }
 0x253   :  { %v1904_v28 = vmax.f32 %v1473_v56, 0.0 }
 0x254   :  { %v1561_v59 = vpop.f32.mrf.mxu0 }
 0x255   :  { %v1562_v8 = vadd.f32 %v1561_v59, %v3648_v40  ;;  %v1650_v30 = vpop.f32.mrf.mxu1 }
 0x256   :  { %v1385_v48 = vpop.f32.mrf.mxu2 }
 0x257   :  { %v3719_v62 = vadd.f32 %v1650_v30, %v1562_v8  ;;  %v1386_v10 = vadd.f32 %v1385_v48, %v4254_v12  ;;  %1600 = vmatmul.bf16.gmra.mxu0 %v4255_v2  ;;  %v4257_v48 = vld [vmem:[#allocation30_spill] sm:$0xff]  ;;  %v2891_v30 = vld [vmem:[%s4168_s5 + $0x60] sm:$0xff] }
 0x258   :  { %v1474_v11 = vpop.f32.mrf.mxu3  ;;  %1689 = vmatmul.bf16.gmra.mxu1 %v4256_v21 }
 0x259   :  { %v1475_v51 = vadd.f32 %v1474_v11, %v1386_v10  ;;  %2208 = vmatpush.bf16.msrb.mxu1 %v2891_v30  ;;  %v2881_v30 = vld [vmem:[%s4168_s5 + $0x10] sm:$0xff] }
 0x25b   :  { %v1906_v23 = vmax.f32 %v1475_v51, 0.0  ;;  %1427 = vmatmul.bf16.gmra.mxu2 %v3594_v33 }
 0x25c   :  { %v3726_v34 = vpop.f32.mrf.mxu0 }
 0x25d   :  { %1516 = vmatmul.bf16.gmra.mxu3 %v3597_v24  ;;  %v3728_v59 = vpop.f32.mrf.mxu1  ;;  %v3730_v8 = vpack.c.bf16 %v1906_v23, %v1904_v28  ;;  %v4258_v23 = vld [vmem:[#allocation12_spill] sm:$0xff] }
 0x25e   :  { %v1388_v6 = vpop.f32.mrf.mxu2 }
 0x25f   :  { %v1389_v25 = vadd.f32 %v1388_v6, %v4257_v48  ;;  %v2882_v6 = vld [vmem:[%s4168_s5 + $0x18] sm:$0xff]  ;;  %v4259_v48 = vld [vmem:[#allocation13_spill] sm:$0xff] }
 0x260   :  { %v1477_v17 = vpop.f32.mrf.mxu3  ;;  %2120 = vmatpush.bf16.msrb.mxu0 %v2882_v6 }
 0x261   :  { %v1478_v56 = vadd.f32 %v1477_v17, %v1389_v25 }
 0x263   :  { %v1908_v17 = vmax.f32 %v1478_v56, 0.0 }
 0x264   :  { %v1566_v12 = vpop.f32.mrf.mxu0  ;;  %2121 = vmatpush.bf16.msrb.mxu0 %v2881_v30 }
 0x265   :  { %v1567_v10 = vadd.f32 %v1566_v12, %v3648_v40  ;;  %v1655_v11 = vpop.f32.mrf.mxu1 }
 0x266   :  { %v1390_v2 = vpop.f32.mrf.mxu2 }
 0x267   :  { %v3740_v21 = vadd.f32 %v1655_v11, %v1567_v10  ;;  %v1391_v51 = vadd.f32 %v1390_v2, %v3453_v60  ;;  %1605 = vmatmul.bf16.gmra.mxu0 %v4258_v23  ;;  %v2879_v23 = vld [vmem:[%s4168_s5] sm:$0xff] }
 0x268   :  { %v1479_v28 = vpop.f32.mrf.mxu3  ;;  %1694 = vmatmul.bf16.gmra.mxu1 %v4259_v48 }
 0x269   :  { %v1480_v25 = vadd.f32 %v1479_v28, %v1391_v51  ;;  %v2880_v51 = vld [vmem:[%s4168_s5 + $0x8] sm:$0xff] }
 0x26a   :  { %2122 = vmatpush.bf16.msrb.mxu0 %v2880_v51 }
 0x26b   :  { %v1910_v29 = vmax.f32 %v1480_v25, 0.0  ;;  %1432 = vmatmul.bf16.gmra.mxu2 %v3612_v50 }
 0x26c   :  { %v3753_v60 = vpop.f32.mrf.mxu0 }
 0x26d   :  { %1521 = vmatmul.bf16.gmra.mxu3 %v3615_v27  ;;  %v3755_v12 = vpop.f32.mrf.mxu1  ;;  %v3757_v10 = vpack.c.bf16 %v1910_v29, %v1908_v17 }
 0x26e   :  { %v1393_v11 = vpop.f32.mrf.mxu2  ;;  %2123 = vmatpush.bf16.msrb.mxu0 %v2879_v23 }
 0x26f   :  { %v1394_v2 = vadd.f32 %v1393_v11, %v3458_v36 }
 0x270   :  { %v1482_v56 = vpop.f32.mrf.mxu3 }
 0x271   :  { %v1483_v28 = vadd.f32 %v1482_v56, %v1394_v2 }
 0x273   :  { %v1912_v2 = vmax.f32 %v1483_v28, 0.0 }
 0x274   :  { %v1571_v6 = vpop.f32.mrf.mxu0 }
 0x275   :  { %v1572_v48 = vadd.f32 %v1571_v6, %v3648_v40  ;;  %v1660_v25 = vpop.f32.mrf.mxu1 }
 0x276   :  { %v1395_v17 = vpop.f32.mrf.mxu2 }
 0x277   :  { %v3767_v29 = vadd.f32 %v1660_v25, %v1572_v48  ;;  %v1396_v36 = vadd.f32 %v1395_v17, %v3474_v53  ;;  %1610 = vmatmul.bf16.gmra.mxu0 %v3293_v43 }
 0x278   :  { %v1484_v30 = vpop.f32.mrf.mxu3  ;;  %1699 = vmatmul.bf16.gmra.mxu1 %v3297_v44  ;;  %v2890_v44 = vld [vmem:[%s4168_s5 + $0x58] sm:$0xff] }
 0x279   :  { %v1485_v11 = vadd.f32 %v1484_v30, %v1396_v36  ;;  %2209 = vmatpush.bf16.msrb.mxu1 %v2890_v44 }
 0x27b   :  { %v1914_v56 = vmax.f32 %v1485_v11, 0.0  ;;  %1437 = vmatmul.bf16.gmra.mxu2 %v3636_v38  ;;  %v4264_v38 = vld [vmem:[#allocation16_spill] sm:$0xff] }
 0x27c   :  { %v3774_v51 = vpop.f32.mrf.mxu0 }
 0x27d   :  { %1526 = vmatmul.bf16.gmra.mxu3 %v3639_v46  ;;  %v3776_v23 = vpop.f32.mrf.mxu1  ;;  %v3778_v6 = vpack.c.bf16 %v1914_v56, %v1912_v2  ;;  %v4262_v46 = vld [vmem:[#allocation14_spill] sm:$0xff] }
 0x27e   :  { %4260 = vst [vmem:[#allocation22_spill] sm:$0xff] %v3776_v23  ;;  %v1398_v48 = vpop.f32.mrf.mxu2  ;;  %v4265_v23 = vld [vmem:[#allocation17_spill] sm:$0xff] }
 0x27f   :  { %v1399_v53 = vadd.f32 %v1398_v48, %v3479_v26  ;;  %v4263_v26 = vld [vmem:[#allocation15_spill] sm:$0xff] }
 0x280   :  { %v1487_v25 = vpop.f32.mrf.mxu3 }
 0x281   :  { %v1488_v43 = vadd.f32 %v1487_v25, %v1399_v53 }
 0x283   :  { %v1916_v53 = vmax.f32 %v1488_v43, 0.0 }
 0x284   :  { %v1576_v28 = vpop.f32.mrf.mxu0 }
 0x285   :  { %v1577_v17 = vadd.f32 %v1576_v28, %v3648_v40  ;;  %v1665_v36 = vpop.f32.mrf.mxu1 }
 0x286   :  { %v1400_v30 = vpop.f32.mrf.mxu2 }
 0x287   :  { %v3785_v11 = vadd.f32 %v1665_v36, %v1577_v17  ;;  %v1401_v2 = vadd.f32 %v1400_v30, %v3492_v19  ;;  %1615 = vmatmul.bf16.gmra.mxu0 %v4262_v46 }
 0x288   :  { %v1489_v56 = vpop.f32.mrf.mxu3  ;;  %1704 = vmatmul.bf16.gmra.mxu1 %v4263_v26 }
 0x289   :  { %4261 = vst [vmem:[#allocation6_spill] sm:$0xff] %v3785_v11  ;;  %v1490_v48 = vadd.f32 %v1489_v56, %v1401_v2 }
 0x28b   :  { %v1918_v25 = vmax.f32 %v1490_v48, 0.0  ;;  %1718 = vmatmul.bf16.vlgmr.msrb.gmra.mxu2 %v4264_v38 }
 0x28c   :  { %v3792_v28 = vpop.f32.mrf.mxu0 }
 0x28d   :  { %1807 = vmatmul.bf16.vlgmr.msrb.gmra.mxu3 %v4265_v23  ;;  %v3794_v44 = vpop.f32.mrf.mxu1  ;;  %v3796_v17 = vpack.c.bf16 %v1918_v25, %v1916_v53 }
 0x28e   :  { %v1403_v36 = vpop.f32.mrf.mxu2 }
 0x28f   :  { %v1404_v19 = vadd.f32 %v1403_v36, %v3497_v47  ;;  %v4266_v47 = vld [vmem:[#allocation18_spill] sm:$0xff] }
 0x290   :  { %v1492_v30 = vpop.f32.mrf.mxu3 }
 0x291   :  { %v1493_v46 = vadd.f32 %v1492_v30, %v1404_v19 }
 0x293   :  { %v1920_v53 = vmax.f32 %v1493_v46, 0.0 }
 0x294   :  { %v1581_v11 = vpop.f32.mrf.mxu0 }
 0x295   :  { %v1582_v2 = vadd.f32 %v1581_v11, %v3648_v40  ;;  %v1670_v43 = vpop.f32.mrf.mxu1 }
 0x296   :  { %v1405_v56 = vpop.f32.mrf.mxu2 }
 0x297   :  { %v3800_v26 = vadd.f32 %v1670_v43, %v1582_v2  ;;  %v1406_v38 = vadd.f32 %v1405_v56, %v3510_v57  ;;  %2124 = vmatmul.bf16.vlgmr.msrb.gmra.mxu0 %v3658_v45  ;;  %v4268_v2 = vld [vmem:[#allocation34_spill] sm:$0xff]  ;;  %v2889_v45 = vld [vmem:[%s4168_s5 + $0x50] sm:$0xff] }
 0x298   :  { %v1494_v23 = vpop.f32.mrf.mxu3  ;;  %2210 = vmatpush.bf16.msrb.mxu1 %v2889_v45 }
 0x299   :  { %v1495_v48 = vadd.f32 %v1494_v23, %v1406_v38 }
 0x29b   :  { %v1922_v25 = vmax.f32 %v1495_v48, 0.0  ;;  %1723 = vmatmul.bf16.gmra.mxu2 %v3363_v49 }
 0x29c   :  { %v3806_v36 = vpop.f32.mrf.mxu0 }
 0x29d   :  { %1812 = vmatmul.bf16.gmra.mxu3 %v4266_v47  ;;  %v3808_v19 = vpop.f32.mrf.mxu1  ;;  %v3810_v11 = vpack.c.bf16 %v1922_v25, %v1920_v53 }
 0x29e   :  { %4267 = vst [vmem:[#allocation7_spill] sm:$0xff] %v3808_v19  ;;  %v1408_v30 = vpop.f32.mrf.mxu2 }
 0x29f   :  { %v1409_v43 = vadd.f32 %v1408_v30, %v4268_v2 }
 0x2a0   :  { %v1497_v57 = vpop.f32.mrf.mxu3 }
 0x2a1   :  { %v1498_v56 = vadd.f32 %v1497_v57, %v1409_v43  ;;  %v4270_v43 = vld [vmem:[#allocation20_spill] sm:$0xff]  ;;  %v4271_v57 = vld [vmem:[#allocation21_spill] sm:$0xff] }
 0x2a3   :  { %v1924_v30 = vmax.f32 %v1498_v56, 0.0 }
 0x2a4   :  { %v1586_v46 = vpop.f32.mrf.mxu0 }
 0x2a5   :  { %v1587_v49 = vadd.f32 %v1586_v46, %v3648_v40  ;;  %v1675_v38 = vpop.f32.mrf.mxu1 }
 0x2a6   :  { %v1410_v23 = vpop.f32.mrf.mxu2 }
 0x2a7   :  { %v3817_v48 = vadd.f32 %v1675_v38, %v1587_v49  ;;  %v1411_v53 = vadd.f32 %v1410_v23, %v3528_v32  ;;  %2129 = vmatmul.bf16.gmra.mxu0 %v3679_v4 }
 0x2a8   :  { %v1499_v25 = vpop.f32.mrf.mxu3 }
 0x2a9   :  { %4269 = vst [vmem:[#allocation23_spill] sm:$0xff] %v3817_v48  ;;  %v1500_v47 = vadd.f32 %v1499_v25, %v1411_v53 }
 0x2ab   :  { %v1926_v2 = vmax.f32 %v1500_v47, 0.0  ;;  %1728 = vmatmul.bf16.gmra.mxu2 %v4270_v43 }
 0x2ac   :  { %v3823_v19 = vpop.f32.mrf.mxu0 }
 0x2ad   :  { %1817 = vmatmul.bf16.gmra.mxu3 %v4271_v57  ;;  %v3825_v46 = vpop.f32.mrf.mxu1  ;;  %v3827_v45 = vpack.c.bf16 %v1926_v2, %v1924_v30 }
 0x2ae   :  { %v1413_v49 = vpop.f32.mrf.mxu2 }
 0x2af   :  { %v1414_v38 = vadd.f32 %v1413_v49, %v3533_v58  ;;  %v4272_v58 = vld [vmem:[#allocation24_spill] sm:$0xff] }
 0x2b0   :  { %v1502_v32 = vpop.f32.mrf.mxu3 }
 0x2b1   :  { %v1503_v23 = vadd.f32 %v1502_v32, %v1414_v38 }
 0x2b3   :  { %v1928_v30 = vmax.f32 %v1503_v23, 0.0 }
 0x2b4   :  { %v1591_v48 = vpop.f32.mrf.mxu0 }
 0x2b5   :  { %v1592_v4 = vadd.f32 %v1591_v48, %v3648_v40  ;;  %v1680_v56 = vpop.f32.mrf.mxu1 }
 0x2b6   :  { %v1415_v53 = vpop.f32.mrf.mxu2 }
 0x2b7   :  { %v3831_v25 = vadd.f32 %v1680_v56, %v1592_v4  ;;  %v1416_v47 = vadd.f32 %v1415_v53, %v3546_v52  ;;  %2134 = vmatmul.bf16.gmra.mxu0 %v3693_v18  ;;  %v4274_v4 = vld [vmem:[#allocation37_spill] sm:$0xff]  ;;  %v2888_v18 = vld [vmem:[%s4168_s5 + $0x48] sm:$0xff] }
 0x2b8   :  { %v1504_v43 = vpop.f32.mrf.mxu3  ;;  %2211 = vmatpush.bf16.msrb.mxu1 %v2888_v18 }
 0x2b9   :  { %v1505_v57 = vadd.f32 %v1504_v43, %v1416_v47 }
 0x2bb   :  { %v1930_v2 = vmax.f32 %v1505_v57, 0.0  ;;  %1733 = vmatmul.bf16.gmra.mxu2 %v3405_v5 }
 0x2bc   :  { %v3837_v49 = vpop.f32.mrf.mxu0 }
 0x2bd   :  { %1822 = vmatmul.bf16.gmra.mxu3 %v4272_v58  ;;  %v3839_v38 = vpop.f32.mrf.mxu1  ;;  %v3841_v48 = vpack.c.bf16 %v1930_v2, %v1928_v30 }
 0x2be   :  { %4273 = vst [vmem:[#allocation25_spill] sm:$0xff] %v3839_v38  ;;  %v1418_v32 = vpop.f32.mrf.mxu2 }
 0x2bf   :  { %v1419_v56 = vadd.f32 %v1418_v32, %v4274_v4 }
 0x2c0   :  { %v1507_v52 = vpop.f32.mrf.mxu3 }
 0x2c1   :  { %v1508_v53 = vadd.f32 %v1507_v52, %v1419_v56  ;;  %v4276_v56 = vld [vmem:[#allocation27_spill] sm:$0xff]  ;;  %v4277_v52 = vld [vmem:[#allocation28_spill] sm:$0xff] }
 0x2c3   :  { %v1932_v32 = vmax.f32 %v1508_v53, 0.0 }
 0x2c4   :  { %v1596_v23 = vpop.f32.mrf.mxu0 }
 0x2c5   :  { %v1597_v5 = vadd.f32 %v1596_v23, %v3648_v40  ;;  %v1685_v47 = vpop.f32.mrf.mxu1 }
 0x2c6   :  { %v1420_v43 = vpop.f32.mrf.mxu2 }
 0x2c7   :  { %v3848_v57 = vadd.f32 %v1685_v47, %v1597_v5  ;;  %v1421_v30 = vadd.f32 %v1420_v43, %v3564_v35  ;;  %2139 = vmatmul.bf16.gmra.mxu0 %v3713_v55 }
 0x2c8   :  { %v1509_v2 = vpop.f32.mrf.mxu3 }
 0x2c9   :  { %4275 = vst [vmem:[#allocation8_spill] sm:$0xff] %v3848_v57  ;;  %v1510_v58 = vadd.f32 %v1509_v2, %v1421_v30 }
 0x2cb   :  { %v1934_v4 = vmax.f32 %v1510_v58, 0.0  ;;  %1738 = vmatmul.bf16.gmra.mxu2 %v4276_v56 }
 0x2cc   :  { %v3854_v38 = vpop.f32.mrf.mxu0 }
 0x2cd   :  { %1827 = vmatmul.bf16.gmra.mxu3 %v4277_v52  ;;  %v3856_v23 = vpop.f32.mrf.mxu1  ;;  %v3858_v18 = vpack.c.bf16 %v1934_v4, %v1932_v32 }
 0x2ce   :  { %v1423_v5 = vpop.f32.mrf.mxu2 }
 0x2cf   :  { %v1424_v47 = vadd.f32 %v1423_v5, %v3569_v16  ;;  %v4278_v16 = vld [vmem:[#allocation31_spill] sm:$0xff] }
 0x2d0   :  { %v1512_v35 = vpop.f32.mrf.mxu3 }
 0x2d1   :  { %v1513_v43 = vadd.f32 %v1512_v35, %v1424_v47 }
 0x2d3   :  { %v1936_v32 = vmax.f32 %v1513_v43, 0.0 }
 0x2d4   :  { %v1601_v57 = vpop.f32.mrf.mxu0 }
 0x2d5   :  { %v1602_v55 = vadd.f32 %v1601_v57, %v3648_v40  ;;  %v1690_v53 = vpop.f32.mrf.mxu1 }
 0x2d6   :  { %v1425_v30 = vpop.f32.mrf.mxu2 }
 0x2d7   :  { %v3862_v2 = vadd.f32 %v1690_v53, %v1602_v55  ;;  %v1426_v58 = vadd.f32 %v1425_v30, %v3582_v0  ;;  %2144 = vmatmul.bf16.gmra.mxu0 %v3730_v8  ;;  %v4280_v55 = vld [vmem:[#allocation42_spill] sm:$0xff]  ;;  %v2887_v8 = vld [vmem:[%s4168_s5 + $0x40] sm:$0xff] }
 0x2d8   :  { %v1514_v56 = vpop.f32.mrf.mxu3  ;;  %2212 = vmatpush.bf16.msrb.mxu1 %v2887_v8 }
 0x2d9   :  { %v1515_v52 = vadd.f32 %v1514_v56, %v1426_v58 }
 0x2db   :  { %v1938_v4 = vmax.f32 %v1515_v52, 0.0  ;;  %1743 = vmatmul.bf16.gmra.mxu2 %v3447_v41 }
 0x2dc   :  { %v3868_v5 = vpop.f32.mrf.mxu0 }
 0x2dd   :  { %1832 = vmatmul.bf16.gmra.mxu3 %v4278_v16  ;;  %v3870_v47 = vpop.f32.mrf.mxu1  ;;  %v3872_v57 = vpack.c.bf16 %v1938_v4, %v1936_v32 }
 0x2de   :  { %4279 = vst [vmem:[#allocation9_spill] sm:$0xff] %v3870_v47  ;;  %v1428_v35 = vpop.f32.mrf.mxu2 }
 0x2df   :  { %v1429_v53 = vadd.f32 %v1428_v35, %v4280_v55 }
 0x2e0   :  { %v1517_v0 = vpop.f32.mrf.mxu3 }
 0x2e1   :  { %v1518_v30 = vadd.f32 %v1517_v0, %v1429_v53  ;;  %v4282_v53 = vld [vmem:[#allocation32_spill] sm:$0xff]  ;;  %v4283_v0 = vld [vmem:[#allocation33_spill] sm:$0xff] }
 0x2e3   :  { %v1940_v35 = vmax.f32 %v1518_v30, 0.0 }
 0x2e4   :  { %v1606_v43 = vpop.f32.mrf.mxu0 }
 0x2e5   :  { %v1607_v41 = vadd.f32 %v1606_v43, %v3648_v40  ;;  %v1695_v58 = vpop.f32.mrf.mxu1 }
 0x2e6   :  { %v1430_v56 = vpop.f32.mrf.mxu2 }
 0x2e7   :  { %v3879_v52 = vadd.f32 %v1695_v58, %v1607_v41  ;;  %v1431_v32 = vadd.f32 %v1430_v56, %v3600_v63  ;;  %2149 = vmatmul.bf16.gmra.mxu0 %v3757_v10 }
 0x2e8   :  { %v1519_v4 = vpop.f32.mrf.mxu3 }
 0x2e9   :  { %4281 = vst [vmem:[#allocation26_spill] sm:$0xff] %v3879_v52  ;;  %v1520_v16 = vadd.f32 %v1519_v4, %v1431_v32 }
 0x2eb   :  { %v1942_v55 = vmax.f32 %v1520_v16, 0.0  ;;  %1748 = vmatmul.bf16.gmra.mxu2 %v4282_v53 }
 0x2ec   :  { %v3885_v47 = vpop.f32.mrf.mxu0 }
 0x2ed   :  { %1837 = vmatmul.bf16.gmra.mxu3 %v4283_v0  ;;  %v3887_v43 = vpop.f32.mrf.mxu1  ;;  %v3889_v8 = vpack.c.bf16 %v1942_v55, %v1940_v35 }
 0x2ee   :  { %v1433_v41 = vpop.f32.mrf.mxu2 }
 0x2ef   :  { %v1434_v58 = vadd.f32 %v1433_v41, %v3605_v54 }
 0x2f0   :  { %v1522_v63 = vpop.f32.mrf.mxu3 }
 0x2f1   :  { %v1523_v56 = vadd.f32 %v1522_v63, %v1434_v58 }
 0x2f3   :  { %v1944_v35 = vmax.f32 %v1523_v56, 0.0 }
 0x2f4   :  { %v1611_v52 = vpop.f32.mrf.mxu0 }
 0x2f5   :  { %v1612_v10 = vadd.f32 %v1611_v52, %v3648_v40  ;;  %v1700_v30 = vpop.f32.mrf.mxu1 }
 0x2f6   :  { %v1435_v32 = vpop.f32.mrf.mxu2 }
 0x2f7   :  { %v3893_v4 = vadd.f32 %v1700_v30, %v1612_v10  ;;  %v1436_v16 = vadd.f32 %v1435_v32, %v3618_v37  ;;  %2154 = vmatmul.bf16.gmra.mxu0 %v3778_v6 }
 0x2f8   :  { %v1524_v53 = vpop.f32.mrf.mxu3 }
 0x2f9   :  { %v1525_v0 = vadd.f32 %v1524_v53, %v1436_v16 }
 0x2fb   :  { %v1946_v55 = vmax.f32 %v1525_v0, 0.0  ;;  %1753 = vmatmul.bf16.gmra.mxu2 %v3486_v15 }
 0x2fc   :  { %v3899_v54 = vpop.f32.mrf.mxu0 }
 0x2fd   :  { %1842 = vmatmul.bf16.gmra.mxu3 %v3489_v61  ;;  %v3901_v41 = vpop.f32.mrf.mxu1  ;;  %v3903_v52 = vpack.c.bf16 %v1946_v55, %v1944_v35 }
 0x2fe   :  { %v1438_v58 = vpop.f32.mrf.mxu2 }
 0x2ff   :  { %v1439_v63 = vadd.f32 %v1438_v58, %v3629_v22 }
 0x300   :  { %v1527_v37 = vpop.f32.mrf.mxu3 }
 0x301   :  { %v1528_v10 = vadd.f32 %v1527_v37, %v1439_v63 }
 0x303   :  { %v1948_v0 = vmax.f32 %v1528_v10, 0.0 }
 0x304   :  { %v1616_v30 = vpop.f32.mrf.mxu0 }
 0x305   :  { %v1617_v6 = vadd.f32 %v1616_v30, %v3648_v40  ;;  %v1705_v56 = vpop.f32.mrf.mxu1 }
 0x306   :  { %v1440_v32 = vpop.f32.mrf.mxu2 }
 0x307   :  { %v3907_v16 = vadd.f32 %v1705_v56, %v1617_v6  ;;  %v1441_v15 = vadd.f32 %v1440_v32, %v3642_v7  ;;  %2159 = vmatmul.bf16.gmra.mxu0 %v3796_v17 }
 0x308   :  { %v1529_v61 = vpop.f32.mrf.mxu3 }
 0x309   :  { %v1530_v53 = vadd.f32 %v1529_v61, %v1441_v15  ;;  %v4284_v15 = vld [vmem:[#allocation45_spill] sm:$0xff] }
 0x30b   :  { %v1950_v35 = vmax.f32 %v1530_v53, 0.0  ;;  %1758 = vmatmul.bf16.gmra.mxu2 %v3504_v14 }
 0x30d   :  { %1847 = vmatmul.bf16.gmra.mxu3 %v3507_v9  ;;  %v3913_v22 = vpack.c.bf16 %v1950_v35, %v1948_v0 }
 0x30e   :  { %v1719_v55 = vpop.f32.mrf.mxu2 }
 0x30f   :  { %v1720_v63 = vadd.f32 %v1719_v55, %v3651_v13 }
 0x310   :  { %v1808_v58 = vpop.f32.mrf.mxu3 }
 0x311   :  { %v1809_v30 = vadd.f32 %v1808_v58, %v1720_v63  ;;  %v4285_v58 = vld [vmem:[#allocation35_spill] sm:$0xff] }
 0x313   :  { %v1889_v10 = vmax.f32 %v1809_v30, 0.0 }
 0x316   :  { %v1721_v37 = vpop.f32.mrf.mxu2 }
 0x317   :  { %v1722_v7 = vadd.f32 %v1721_v37, %v3661_v31  ;;  %2164 = vmatmul.bf16.gmra.mxu0 %v3810_v11 }
 0x318   :  { %v1810_v6 = vpop.f32.mrf.mxu3 }
 0x319   :  { %v1811_v17 = vadd.f32 %v1810_v6, %v1722_v7  ;;  %v3926_v6 = vpop.f32.mrf.mxu0 }
 0x31b   :  { %v1891_v56 = vmax.f32 %v1811_v17, 0.0  ;;  %1763 = vmatmul.bf16.gmra.mxu2 %v3522_v39  ;;  %v4286_v39 = vld [vmem:[#allocation36_spill] sm:$0xff]  ;;  %v4287_v17 = vld [vmem:[#allocation5_spill] sm:$0xff] }
 0x31d   :  { %1852 = vmatmul.bf16.gmra.mxu3 %v3525_v20  ;;  %v1953_v14 = vpack.c.bf16 %v1891_v56, %v1889_v10 }
 0x31e   :  { %v1724_v9 = vpop.f32.mrf.mxu2 }
 0x31f   :  { %2213 = vmatmul.bf16.vlgmr.msrb.gmra.mxu1 %v1953_v14  ;;  %v1725_v13 = vadd.f32 %v1724_v9, %v4284_v15  ;;  %v4289_v15 = vld [vmem:[#allocation39_spill] sm:$0xff] }
 0x320   :  { %v1813_v32 = vpop.f32.mrf.mxu3 }
 0x321   :  { %v1814_v53 = vadd.f32 %v1813_v32, %v1725_v13  ;;  %v4288_v32 = vld [vmem:[#allocation38_spill] sm:$0xff] }
 0x323   :  { %v1893_v35 = vmax.f32 %v1814_v53, 0.0 }
 0x326   :  { %v1726_v61 = vpop.f32.mrf.mxu2 }
 0x327   :  { %v1727_v31 = vadd.f32 %v1726_v61, %v3681_v42  ;;  %2169 = vmatmul.bf16.gmra.mxu0 %v3827_v45 }
 0x328   :  { %v1815_v0 = vpop.f32.mrf.mxu3 }
 0x329   :  { %v1816_v11 = vadd.f32 %v1815_v0, %v1727_v31  ;;  %v4290_v31 = vld [vmem:[#allocation19_spill] sm:$0xff] }
 0x32b   :  { %v1895_v55 = vmax.f32 %v1816_v11, 0.0  ;;  %1768 = vmatmul.bf16.gmra.mxu2 %v4285_v58 }
 0x32d   :  { %1857 = vmatmul.bf16.gmra.mxu3 %v4286_v39  ;;  %v1955_v20 = vpack.c.bf16 %v1895_v55, %v1893_v35 }
 0x32e   :  { %v1729_v63 = vpop.f32.mrf.mxu2 }
 0x32f   :  { %2218 = vmatmul.bf16.gmra.mxu1 %v1955_v20  ;;  %v1730_v30 = vadd.f32 %v1729_v63, %v3685_v1  ;;  %v3932_v1 = vpop.f32.mrf.mxu0 }
 0x330   :  { %v1818_v37 = vpop.f32.mrf.mxu3 }
 0x331   :  { %v1819_v42 = vadd.f32 %v1818_v37, %v1730_v30  ;;  %v4291_v37 = vld [vmem:[#allocation40_spill] sm:$0xff]  ;;  %v4292_v30 = vld [vmem:[#allocation41_spill] sm:$0xff] }
 0x333   :  { %v1897_v14 = vmax.f32 %v1819_v42, 0.0 }
 0x336   :  { %v1731_v7 = vpop.f32.mrf.mxu2 }
 0x337   :  { %v1732_v10 = vadd.f32 %v1731_v7, %v4287_v17  ;;  %2174 = vmatmul.bf16.gmra.mxu0 %v3841_v48  ;;  %v3937_v39 = vpop.f32.mrf.mxu0 }
 0x338   :  { %v1820_v45 = vpop.f32.mrf.mxu3 }
 0x339   :  { %v1821_v56 = vadd.f32 %v1820_v45, %v1732_v10  ;;  %v1564_v10 = vadd.f32 %v3726_v34, %v3648_v40 }
 0x33b   :  { %v1899_v9 = vmax.f32 %v1821_v56, 0.0  ;;  %1773 = vmatmul.bf16.gmra.mxu2 %v4288_v32 }
 0x33d   :  { %1862 = vmatmul.bf16.gmra.mxu3 %v4289_v15  ;;  %v1957_v13 = vpack.c.bf16 %v1899_v9, %v1897_v14 }
 0x33e   :  { %v1734_v61 = vpop.f32.mrf.mxu2 }
 0x33f   :  { %2223 = vmatmul.bf16.gmra.mxu1 %v1957_v13  ;;  %v1735_v0 = vadd.f32 %v1734_v61, %v4290_v31  ;;  %v3945_v45 = vpop.f32.mrf.mxu0  ;;  %v1569_v31 = vadd.f32 %v3753_v60, %v3648_v40 }
 0x340   :  { %v1823_v53 = vpop.f32.mrf.mxu3 }
 0x341   :  { %v1824_v35 = vadd.f32 %v1823_v53, %v1735_v0 }
 0x343   :  { %v1901_v20 = vmax.f32 %v1824_v35, 0.0 }
 0x346   :  { %v1736_v11 = vpop.f32.mrf.mxu2 }
 0x347   :  { %v1737_v55 = vadd.f32 %v1736_v11, %v3715_v3  ;;  %2179 = vmatmul.bf16.gmra.mxu0 %v3858_v18  ;;  %v1653_v18 = vadd.f32 %v3728_v59, %v1564_v10 }
 0x348   :  { %v1825_v48 = vpop.f32.mrf.mxu3 }
 0x349   :  { %v1826_v58 = vadd.f32 %v1825_v48, %v1737_v55 }
 0x34b   :  { %v1903_v63 = vmax.f32 %v1826_v58, 0.0  ;;  %1778 = vmatmul.bf16.gmra.mxu2 %v4291_v37 }
 0x34d   :  { %1867 = vmatmul.bf16.gmra.mxu3 %v4292_v30  ;;  %v1959_v7 = vpack.c.bf16 %v1903_v63, %v1901_v20  ;;  %v4293_v30 = vld [vmem:[#allocation22_spill] sm:$0xff] }
 0x34e   :  { %v1739_v42 = vpop.f32.mrf.mxu2 }
 0x34f   :  { %2228 = vmatmul.bf16.gmra.mxu1 %v1959_v7  ;;  %v1740_v3 = vadd.f32 %v1739_v42, %v3719_v62  ;;  %v3950_v62 = vpop.f32.mrf.mxu0 }
 0x350   :  { %v1828_v17 = vpop.f32.mrf.mxu3 }
 0x351   :  { %v1829_v14 = vadd.f32 %v1828_v17, %v1740_v3 }
 0x353   :  { %v1905_v13 = vmax.f32 %v1829_v14, 0.0  ;;  %v4295_v14 = vld [vmem:[#allocation44_spill] sm:$0xff] }
 0x356   :  { %v1741_v56 = vpop.f32.mrf.mxu2 }
 0x357   :  { %v1742_v9 = vadd.f32 %v1741_v56, %v1653_v18  ;;  %2184 = vmatmul.bf16.gmra.mxu0 %v3872_v57  ;;  %v1658_v57 = vadd.f32 %v3755_v12, %v1569_v31  ;;  %v1574_v12 = vadd.f32 %v3774_v51, %v3648_v40  ;;  %v4294_v56 = vld [vmem:[#allocation43_spill] sm:$0xff] }
 0x358   :  { %v1830_v32 = vpop.f32.mrf.mxu3 }
 0x359   :  { %v1831_v15 = vadd.f32 %v1830_v32, %v1742_v9  ;;  %v1663_v7 = vadd.f32 %v4293_v30, %v1574_v12 }
 0x35b   :  { %v1907_v61 = vmax.f32 %v1831_v15, 0.0  ;;  %1783 = vmatmul.bf16.gmra.mxu2 %v3594_v33  ;;  %v3957_v33 = vpop.f32.mrf.mxu0  ;;  %v1579_v15 = vadd.f32 %v3792_v28, %v3648_v40  ;;  %v1584_v28 = vadd.f32 %v3806_v36, %v3648_v40 }
 0x35d   :  { %1872 = vmatmul.bf16.gmra.mxu3 %v3597_v24  ;;  %v1961_v34 = vpack.c.bf16 %v1907_v61, %v1905_v13  ;;  %v4296_v13 = vld [vmem:[#allocation6_spill] sm:$0xff] }
 0x35e   :  { %v1744_v53 = vpop.f32.mrf.mxu2 }
 0x35f   :  { %2233 = vmatmul.bf16.gmra.mxu1 %v1961_v34  ;;  %v1745_v0 = vadd.f32 %v1744_v53, %v3740_v21 }
 0x360   :  { %v1833_v59 = vpop.f32.mrf.mxu3 }
 0x361   :  { %v1834_v35 = vadd.f32 %v1833_v59, %v1745_v0 }
 0x363   :  { %v1909_v58 = vmax.f32 %v1834_v35, 0.0  ;;  %v3963_v37 = vpop.f32.mrf.mxu0 }
 0x366   :  { %v1746_v11 = vpop.f32.mrf.mxu2 }
 0x367   :  { %v1747_v55 = vadd.f32 %v1746_v11, %v1658_v57  ;;  %2189 = vmatmul.bf16.gmra.mxu0 %v3889_v8 }
 0x368   :  { %v1835_v48 = vpop.f32.mrf.mxu3 }
 0x369   :  { %v1836_v24 = vadd.f32 %v1835_v48, %v1747_v55 }
 0x36b   :  { %v1911_v20 = vmax.f32 %v1836_v24, 0.0  ;;  %1788 = vmatmul.bf16.gmra.mxu2 %v3612_v50  ;;  %v3970_v51 = vpop.f32.mrf.mxu0 }
 0x36d   :  { %1877 = vmatmul.bf16.gmra.mxu3 %v3615_v27  ;;  %v1963_v60 = vpack.c.bf16 %v1911_v20, %v1909_v58  ;;  %v3982_v58 = vpop.f32.mrf.mxu1  ;;  %v4297_v20 = vld [vmem:[#allocation7_spill] sm:$0xff] }
 0x36e   :  { %v1749_v63 = vpop.f32.mrf.mxu2 }
 0x36f   :  { %2238 = vmatmul.bf16.gmra.mxu1 %v1963_v60  ;;  %v1750_v8 = vadd.f32 %v1749_v63, %v3767_v29  ;;  %v1673_v60 = vadd.f32 %v4297_v20, %v1584_v28  ;;  %v4299_v28 = vld [vmem:[#allocation25_spill] sm:$0xff] }
 0x370   :  { %v1838_v21 = vpop.f32.mrf.mxu3 }
 0x371   :  { %v1839_v17 = vadd.f32 %v1838_v21, %v1750_v8 }
 0x373   :  { %v1913_v27 = vmax.f32 %v1839_v17, 0.0  ;;  %v3976_v53 = vpop.f32.mrf.mxu0 }
 0x376   :  { %v1751_v42 = vpop.f32.mrf.mxu2 }
 0x377   :  { %v1752_v10 = vadd.f32 %v1751_v42, %v1663_v7  ;;  %2194 = vmatmul.bf16.gmra.mxu0 %v3903_v52  ;;  %v1668_v52 = vadd.f32 %v3794_v44, %v1579_v15 }
 0x378   :  { %v1840_v3 = vpop.f32.mrf.mxu3 }
 0x379   :  { %v1841_v50 = vadd.f32 %v1840_v3, %v1752_v10 }
 0x37b   :  { %v1915_v18 = vmax.f32 %v1841_v50, 0.0  ;;  %1793 = vmatmul.bf16.gmra.mxu2 %v4294_v56  ;;  %v4298_v56 = vld [vmem:[#allocation23_spill] sm:$0xff] }
 0x37d   :  { %1882 = vmatmul.bf16.gmra.mxu3 %v4295_v14  ;;  %v1965_v9 = vpack.c.bf16 %v1915_v18, %v1913_v27  ;;  %v1589_v27 = vadd.f32 %v3823_v19, %v3648_v40 }
 0x37e   :  { %v1754_v32 = vpop.f32.mrf.mxu2 }
 0x37f   :  { %2243 = vmatmul.bf16.gmra.mxu1 %v1965_v9  ;;  %v1755_v61 = vadd.f32 %v1754_v32, %v4296_v13  ;;  %v1678_v9 = vadd.f32 %v3825_v46, %v1589_v27 }
 0x380   :  { %v1843_v29 = vpop.f32.mrf.mxu3 }
 0x381   :  { %v1844_v59 = vadd.f32 %v1843_v29, %v1755_v61 }
 0x383   :  { %v1917_v11 = vmax.f32 %v1844_v59, 0.0 }
 0x386   :  { %v1756_v34 = vpop.f32.mrf.mxu2 }
 0x387   :  { %v1757_v31 = vadd.f32 %v1756_v34, %v1668_v52  ;;  %2199 = vmatmul.bf16.gmra.mxu0 %v3913_v22  ;;  %v3988_v22 = vld [vmem:[%s4169_s6] ss:$0 sm:$0xff]  ;;  %v4004_v34 = vpop.f32.mrf.mxu0 }
 0x388   :  { %v1845_v0 = vpop.f32.mrf.mxu3  ;;  %v2126_v7 = vadd.f32 %v3988_v22, %v3932_v1  ;;  %v2128_v18 = vadd.f32 %v3988_v22, %v3937_v39  ;;  %v2131_v19 = vadd.f32 %v3988_v22, %v3945_v45 }
 0x389   :  { %v1846_v57 = vadd.f32 %v1845_v0, %v1757_v31 }
 0x38b   :  { %v1919_v35 = vmax.f32 %v1846_v57, 0.0 }
 0x38d   :  { %v1967_v55 = vpack.c.bf16 %v1919_v35, %v1917_v11  ;;  %v1594_v35 = vadd.f32 %v3837_v49, %v3648_v40 }
 0x38e   :  { %v1759_v48 = vpop.f32.mrf.mxu2 }
 0x38f   :  { %2248 = vmatmul.bf16.gmra.mxu1 %v1967_v55  ;;  %v1760_v44 = vadd.f32 %v1759_v48, %v3800_v26  ;;  %v2133_v55 = vadd.f32 %v3988_v22, %v3950_v62  ;;  %v4016_v48 = vpop.f32.mrf.mxu0  ;;  %v2136_v62 = vadd.f32 %v3988_v22, %v3957_v33  ;;  %v2138_v33 = vadd.f32 %v3988_v22, %v3963_v37 }
 0x390   :  { %v1848_v24 = vpop.f32.mrf.mxu3 }
 0x391   :  { %v1849_v21 = vadd.f32 %v1848_v24, %v1760_v44  ;;  %v1683_v44 = vadd.f32 %v4299_v28, %v1594_v35 }
 0x393   :  { %v1921_v36 = vmax.f32 %v1849_v21, 0.0 }
 0x396   :  { %v1761_v63 = vpop.f32.mrf.mxu2 }
 0x397   :  { %v1762_v12 = vadd.f32 %v1761_v63, %v1673_v60 }
 0x398   :  { %v1850_v8 = vpop.f32.mrf.mxu3 }
 0x399   :  { %v1851_v30 = vadd.f32 %v1850_v8, %v1762_v12 }
 0x39b   :  { %v1923_v42 = vmax.f32 %v1851_v30, 0.0 }
 0x39c   :  { %v2214_v26 = vpop.f32.mrf.mxu1 }
 0x39d   :  { %v1969_v17 = vpack.c.bf16 %v1923_v42, %v1921_v36  ;;  %v2215_v10 = vadd.f32 %v2214_v26, %v2126_v7  ;;  %v4024_v42 = vpop.f32.mrf.mxu0 }
 0x39e   :  { %v1764_v3 = vpop.f32.mrf.mxu2 }
 0x39f   :  { %2294 = vst [vmem:[%s4170_s7] sm:$0xff] %v2215_v10  ;;  %2253 = vmatmul.bf16.gmra.mxu1 %v1969_v17  ;;  %v1765_v1 = vadd.f32 %v1764_v3, %v4298_v56  ;;  %v1599_v10 = vadd.f32 %v3854_v38, %v3648_v40  ;;  %v4300_v3 = vld [vmem:[#allocation8_spill] sm:$0xff]  ;;  %v2141_v38 = vadd.f32 %v3988_v22, %v3970_v51 }
 0x3a0   :  { %v1853_v50 = vpop.f32.mrf.mxu3 }
 0x3a1   :  { %v1854_v15 = vadd.f32 %v1853_v50, %v1765_v1 }
 0x3a3   :  { %v1925_v39 = vmax.f32 %v1854_v15, 0.0 }
 0x3a4   :  { %v2216_v14 = vpop.f32.mrf.mxu1 }
 0x3a5   :  { %v2217_v32 = vadd.f32 %v2216_v14, %v2128_v18  ;;  %v1688_v18 = vadd.f32 %v3856_v23, %v1599_v10 }
 0x3a6   :  { %v1766_v29 = vpop.f32.mrf.mxu2 }
 0x3a7   :  { %2295 = vst [vmem:[%s4170_s7 + $0x8] sm:$0xff] %v2217_v32  ;;  %v1767_v13 = vadd.f32 %v1766_v29, %v1678_v9  ;;  %v2152_v29 = vpop.f32.mrf.mxu0 }
 0x3a8   :  { %v1855_v61 = vpop.f32.mrf.mxu3 }
 0x3a9   :  { %v1856_v52 = vadd.f32 %v1855_v61, %v1767_v13 }
 0x3ab   :  { %v1927_v59 = vmax.f32 %v1856_v52, 0.0 }
 0x3ac   :  { %v2219_v31 = vpop.f32.mrf.mxu1 }
 0x3ad   :  { %v1971_v0 = vpack.c.bf16 %v1927_v59, %v1925_v39  ;;  %v2220_v46 = vadd.f32 %v2219_v31, %v2131_v19  ;;  %v1604_v59 = vadd.f32 %v3868_v5, %v3648_v40  ;;  %v2146_v5 = vadd.f32 %v3988_v22, %v4004_v34  ;;  %v4302_v34 = vld [vmem:[#allocation26_spill] sm:$0xff] }
 0x3ae   :  { %v1769_v57 = vpop.f32.mrf.mxu2 }
 0x3af   :  { %2296 = vst [vmem:[%s4170_s7 + $0x10] sm:$0xff] %v2220_v46  ;;  %2258 = vmatmul.bf16.gmra.mxu1 %v1971_v0  ;;  %v1770_v45 = vadd.f32 %v1769_v57, %v3831_v25  ;;  %v2155_v31 = vpop.f32.mrf.mxu0  ;;  %v2143_v0 = vadd.f32 %v3988_v22, %v3976_v53  ;;  %v4301_v57 = vld [vmem:[#allocation9_spill] sm:$0xff] }
 0x3b0   :  { %v1858_v11 = vpop.f32.mrf.mxu3 }
 0x3b1   :  { %v1859_v63 = vadd.f32 %v1858_v11, %v1770_v45  ;;  %v1693_v11 = vadd.f32 %v4301_v57, %v1604_v59 }
 0x3b3   :  { %v1929_v8 = vmax.f32 %v1859_v63, 0.0 }
 0x3b4   :  { %v2221_v24 = vpop.f32.mrf.mxu1 }
 0x3b5   :  { %v2222_v20 = vadd.f32 %v2221_v24, %v2133_v55 }
 0x3b6   :  { %v1771_v60 = vpop.f32.mrf.mxu2 }
 0x3b7   :  { %2297 = vst [vmem:[%s4170_s7 + $0x18] sm:$0xff] %v2222_v20  ;;  %v1772_v21 = vadd.f32 %v1771_v60, %v1683_v44  ;;  %v2157_v60 = vpop.f32.mrf.mxu0 }
 0x3b8   :  { %v1860_v12 = vpop.f32.mrf.mxu3 }
 0x3b9   :  { %v1861_v49 = vadd.f32 %v1860_v12, %v1772_v21 }
 0x3bb   :  { %v1931_v25 = vmax.f32 %v1861_v49, 0.0 }
 0x3bc   :  { %v2224_v30 = vpop.f32.mrf.mxu1 }
 0x3bd   :  { %v1973_v7 = vpack.c.bf16 %v1931_v25, %v1929_v8  ;;  %v2225_v36 = vadd.f32 %v2224_v30, %v2136_v62  ;;  %v1609_v62 = vadd.f32 %v3885_v47, %v3648_v40  ;;  %v2148_v8 = vadd.f32 %v3988_v22, %v4016_v48 }
 0x3be   :  { %v1774_v26 = vpop.f32.mrf.mxu2  ;;  %v2151_v47 = vadd.f32 %v3988_v22, %v4024_v42 }
 0x3bf   :  { %2298 = vst [vmem:[%s4170_s7 + $0x20] sm:$0xff] %v2225_v36  ;;  %2263 = vmatmul.bf16.gmra.mxu1 %v1973_v7  ;;  %v1775_v50 = vadd.f32 %v1774_v26, %v4300_v3  ;;  %v1698_v7 = vadd.f32 %v3887_v43, %v1609_v62  ;;  %v2160_v26 = vpop.f32.mrf.mxu0 }
 0x3c0   :  { %v1863_v17 = vpop.f32.mrf.mxu3 }
 0x3c1   :  { %v1864_v14 = vadd.f32 %v1863_v17, %v1775_v50 }
 0x3c3   :  { %v1933_v37 = vmax.f32 %v1864_v14, 0.0 }
 0x3c4   :  { %v2226_v27 = vpop.f32.mrf.mxu1 }
 0x3c5   :  { %v2227_v56 = vadd.f32 %v2226_v27, %v2138_v33 }
 0x3c6   :  { %v1776_v1 = vpop.f32.mrf.mxu2 }
 0x3c7   :  { %2299 = vst [vmem:[%s4170_s7 + $0x28] sm:$0xff] %v2227_v56  ;;  %v1777_v9 = vadd.f32 %v1776_v1, %v1688_v18 }
 0x3c8   :  { %v1865_v32 = vpop.f32.mrf.mxu3 }
 0x3c9   :  { %v1866_v15 = vadd.f32 %v1865_v32, %v1777_v9  ;;  %v2162_v9 = vpop.f32.mrf.mxu0  ;;  %v1614_v32 = vadd.f32 %v3899_v54, %v3648_v40  ;;  %v2156_v54 = vadd.f32 %v3988_v22, %v2155_v31 }
 0x3cb   :  { %v1935_v13 = vmax.f32 %v1866_v15, 0.0  ;;  %v2153_v15 = vadd.f32 %v3988_v22, %v2152_v29 }
 0x3cc   :  { %v2229_v61 = vpop.f32.mrf.mxu1 }
 0x3cd   :  { %v1975_v52 = vpack.c.bf16 %v1935_v13, %v1933_v37  ;;  %v2230_v19 = vadd.f32 %v2229_v61, %v2141_v38  ;;  %v1703_v37 = vadd.f32 %v3901_v41, %v1614_v32 }
 0x3ce   :  { %v1779_v23 = vpop.f32.mrf.mxu2 }
 0x3cf   :  { %2300 = vst [vmem:[%s4170_s7 + $0x30] sm:$0xff] %v2230_v19  ;;  %2268 = vmatmul.bf16.gmra.mxu1 %v1975_v52  ;;  %v1780_v51 = vadd.f32 %v1779_v23, %v3862_v2 }
 0x3d0   :  { %v1868_v39 = vpop.f32.mrf.mxu3 }
 0x3d1   :  { %v1869_v45 = vadd.f32 %v1868_v39, %v1780_v51  ;;  %v2165_v59 = vpop.f32.mrf.mxu0 }
 0x3d3   :  { %v1937_v20 = vmax.f32 %v1869_v45, 0.0 }
 0x3d4   :  { %v2231_v46 = vpop.f32.mrf.mxu1 }
 0x3d5   :  { %v2232_v35 = vadd.f32 %v2231_v46, %v2143_v0 }
 0x3d6   :  { %v1781_v55 = vpop.f32.mrf.mxu2 }
 0x3d7   :  { %2301 = vst [vmem:[%s4170_s7 + $0x38] sm:$0xff] %v2232_v35  ;;  %v1782_v24 = vadd.f32 %v1781_v55, %v1693_v11  ;;  %v1619_v11 = vadd.f32 %v3926_v6, %v3648_v40  ;;  %v2158_v35 = vadd.f32 %v3988_v22, %v2157_v60  ;;  %v2161_v40 = vadd.f32 %v3988_v22, %v2160_v26 }
 0x3d8   :  { %v1870_v28 = vpop.f32.mrf.mxu3 }
 0x3d9   :  { %v1871_v44 = vadd.f32 %v1870_v28, %v1782_v24  ;;  %v2167_v31 = vpop.f32.mrf.mxu0  ;;  %v1708_v24 = vadd.f32 %v3982_v58, %v1619_v11  ;;  %v2163_v58 = vadd.f32 %v3988_v22, %v2162_v9 }
 0x3db   :  { %v1939_v53 = vmax.f32 %v1871_v44, 0.0 }
 0x3dc   :  { %v2234_v2 = vpop.f32.mrf.mxu1 }
 0x3dd   :  { %v1977_v63 = vpack.c.bf16 %v1939_v53, %v1937_v20  ;;  %v2235_v21 = vadd.f32 %v2234_v2, %v2146_v5 }
 0x3de   :  { %v1784_v12 = vpop.f32.mrf.mxu2 }
 0x3df   :  { %2302 = vst [vmem:[%s4170_s7 + $0x40] sm:$0xff] %v2235_v21  ;;  %2273 = vmatmul.bf16.gmra.mxu1 %v1977_v63  ;;  %v1785_v25 = vadd.f32 %v1784_v12, %v4302_v34  ;;  %v2166_v34 = vadd.f32 %v3988_v22, %v2165_v59 }
 0x3e0   :  { %v1873_v49 = vpop.f32.mrf.mxu3 }
 0x3e1   :  { %v1874_v10 = vadd.f32 %v1873_v49, %v1785_v25  ;;  %v2170_v12 = vpop.f32.mrf.mxu0 }
 0x3e3   :  { %v1941_v48 = vmax.f32 %v1874_v10, 0.0  ;;  %v2171_v10 = vadd.f32 %v3988_v22, %v2170_v12 }
 0x3e4   :  { %v2236_v30 = vpop.f32.mrf.mxu1 }
 0x3e5   :  { %v2237_v36 = vadd.f32 %v2236_v30, %v2148_v8 }
 0x3e6   :  { %v1786_v17 = vpop.f32.mrf.mxu2 }
 0x3e7   :  { %2303 = vst [vmem:[%s4170_s7 + $0x48] sm:$0xff] %v2237_v36  ;;  %v1787_v33 = vadd.f32 %v1786_v17, %v1698_v7  ;;  %v2168_v36 = vadd.f32 %v3988_v22, %v2167_v31 }
 0x3e8   :  { %v1875_v3 = vpop.f32.mrf.mxu3 }
 0x3e9   :  { %v1876_v50 = vadd.f32 %v1875_v3, %v1787_v33  ;;  %v2172_v8 = vpop.f32.mrf.mxu0 }
 0x3eb   :  { %v1943_v27 = vmax.f32 %v1876_v50, 0.0 }
 0x3ec   :  { %v2239_v18 = vpop.f32.mrf.mxu1 }
 0x3ed   :  { %v1979_v56 = vpack.c.bf16 %v1943_v27, %v1941_v48  ;;  %v2240_v1 = vadd.f32 %v2239_v18, %v2151_v47  ;;  %v2173_v47 = vadd.f32 %v3988_v22, %v2172_v8 }
 0x3ee   :  { %v1789_v43 = vpop.f32.mrf.mxu2 }
 0x3ef   :  { %2304 = vst [vmem:[%s4170_s7 + $0x50] sm:$0xff] %v2240_v1  ;;  %2278 = vmatmul.bf16.gmra.mxu1 %v1979_v56  ;;  %v1790_v42 = vadd.f32 %v1789_v43, %v3893_v4 }
 0x3f0   :  { %v1878_v14 = vpop.f32.mrf.mxu3 }
 0x3f1   :  { %v1879_v52 = vadd.f32 %v1878_v14, %v1790_v42  ;;  %v2175_v7 = vpop.f32.mrf.mxu0 }
 0x3f2   :  { %v2176_v56 = vadd.f32 %v3988_v22, %v2175_v7 }
 0x3f3   :  { %v1945_v0 = vmax.f32 %v1879_v52, 0.0 }
 0x3f4   :  { %v2241_v38 = vpop.f32.mrf.mxu1 }
 0x3f5   :  { %v2242_v13 = vadd.f32 %v2241_v38, %v2153_v15 }
 0x3f6   :  { %v1791_v61 = vpop.f32.mrf.mxu2 }
 0x3f7   :  { %2305 = vst [vmem:[%s4170_s7 + $0x58] sm:$0xff] %v2242_v13  ;;  %v1792_v19 = vadd.f32 %v1791_v61, %v1703_v37 }
 0x3f8   :  { %v1880_v23 = vpop.f32.mrf.mxu3 }
 0x3f9   :  { %v1881_v39 = vadd.f32 %v1880_v23, %v1792_v19  ;;  %v2177_v33 = vpop.f32.mrf.mxu0 }
 0x3fa   :  { %v2178_v9 = vadd.f32 %v3988_v22, %v2177_v33 }
 0x3fb   :  { %v1947_v29 = vmax.f32 %v1881_v39, 0.0 }
 0x3fc   :  { %v2244_v51 = vpop.f32.mrf.mxu1 }
 0x3fd   :  { %v1981_v4 = vpack.c.bf16 %v1947_v29, %v1945_v0  ;;  %v2245_v46 = vadd.f32 %v2244_v51, %v2156_v54 }
 0x3fe   :  { %v1794_v57 = vpop.f32.mrf.mxu2 }
 0x3ff   :  { %2306 = vst [vmem:[%s4170_s7 + $0x60] sm:$0xff] %v2245_v46  ;;  %2283 = vmatmul.bf16.gmra.mxu1 %v1981_v4  ;;  %v1795_v55 = vadd.f32 %v1794_v57, %v3907_v16 }
 0x400   :  { %v1883_v41 = vpop.f32.mrf.mxu3 }
 0x401   :  { %v1884_v5 = vadd.f32 %v1883_v41, %v1795_v55  ;;  %v2180_v18 = vpop.f32.mrf.mxu0 }
 0x402   :  { %v2181_v38 = vadd.f32 %v3988_v22, %v2180_v18 }
 0x403   :  { %v1949_v6 = vmax.f32 %v1884_v5, 0.0 }
 0x404   :  { %v2246_v45 = vpop.f32.mrf.mxu1 }
 0x405   :  { %v2247_v28 = vadd.f32 %v2246_v45, %v2158_v35 }
 0x406   :  { %v1796_v44 = vpop.f32.mrf.mxu2 }
 0x407   :  { %2307 = vst [vmem:[%s4170_s7 + $0x68] sm:$0xff] %v2247_v28  ;;  %v1797_v20 = vadd.f32 %v1796_v44, %v1708_v24 }
 0x408   :  { %v1885_v53 = vpop.f32.mrf.mxu3 }
 0x409   :  { %v1886_v2 = vadd.f32 %v1885_v53, %v1797_v20  ;;  %v2182_v14 = vpop.f32.mrf.mxu0 }
 0x40a   :  { %v2183_v61 = vadd.f32 %v3988_v22, %v2182_v14 }
 0x40b   :  { %v1951_v60 = vmax.f32 %v1886_v2, 0.0 }
 0x40c   :  { %v2249_v63 = vpop.f32.mrf.mxu1 }
 0x40d   :  { %v1983_v16 = vpack.c.bf16 %v1951_v60, %v1949_v6  ;;  %v2250_v21 = vadd.f32 %v2249_v63, %v2161_v40 }
 0x40f   :  { %2308 = vst [vmem:[%s4170_s7 + $0x70] sm:$0xff] %v2250_v21  ;;  %2288 = vmatmul.bf16.gmra.mxu1 %v1983_v16 }
 0x411   :  { %v2185_v42 = vpop.f32.mrf.mxu0 }
 0x412   :  { %v2186_v39 = vadd.f32 %v3988_v22, %v2185_v42 }
 0x414   :  { %v2251_v49 = vpop.f32.mrf.mxu1 }
 0x415   :  { %v2252_v62 = vadd.f32 %v2251_v49, %v2163_v58 }
 0x417   :  { %2309 = vst [vmem:[%s4170_s7 + $0x78] sm:$0xff] %v2252_v62 }
 0x419   :  { %v2187_v52 = vpop.f32.mrf.mxu0 }
 0x41a   :  { %v2188_v29 = vadd.f32 %v3988_v22, %v2187_v52 }
 0x41c   :  { %v2254_v25 = vpop.f32.mrf.mxu1 }
 0x41d   :  { %v2255_v30 = vadd.f32 %v2254_v25, %v2166_v34 }
 0x41f   :  { %2310 = vst [vmem:[%s4170_s7 + $0x80] sm:$0xff] %v2255_v30 }
 0x421   :  { %v2190_v0 = vpop.f32.mrf.mxu0 }
 0x422   :  { %v2191_v57 = vadd.f32 %v3988_v22, %v2190_v0 }
 0x424   :  { %v2256_v26 = vpop.f32.mrf.mxu1 }
 0x425   :  { %v2257_v17 = vadd.f32 %v2256_v26, %v2168_v36 }
 0x427   :  { %2311 = vst [vmem:[%s4170_s7 + $0x88] sm:$0xff] %v2257_v17 }
 0x429   :  { %v2192_v46 = vpop.f32.mrf.mxu0 }
 0x42a   :  { %v2193_v55 = vadd.f32 %v3988_v22, %v2192_v46 }
 0x42c   :  { %v2259_v3 = vpop.f32.mrf.mxu1 }
 0x42d   :  { %v2260_v50 = vadd.f32 %v2259_v3, %v2171_v10 }
 0x42f   :  { %2312 = vst [vmem:[%s4170_s7 + $0x90] sm:$0xff] %v2260_v50 }
 0x431   :  { %v2195_v35 = vpop.f32.mrf.mxu0 }
 0x432   :  { %v2196_v24 = vadd.f32 %v3988_v22, %v2195_v35 }
 0x434   :  { %v2261_v48 = vpop.f32.mrf.mxu1 }
 0x435   :  { %v2262_v27 = vadd.f32 %v2261_v48, %v2173_v47 }
 0x437   :  { %2313 = vst [vmem:[%s4170_s7 + $0x98] sm:$0xff] %v2262_v27 }
 0x439   :  { %v2197_v28 = vpop.f32.mrf.mxu0 }
 0x43a   :  { %v2198_v20 = vadd.f32 %v3988_v22, %v2197_v28 }
 0x43c   :  { %v2264_v1 = vpop.f32.mrf.mxu1 }
 0x43d   :  { %v2265_v43 = vadd.f32 %v2264_v1, %v2176_v56 }
 0x43f   :  { %2314 = vst [vmem:[%s4170_s7 + $0xa0] sm:$0xff] %v2265_v43 }
 0x441   :  { %v2200_v40 = vpop.f32.mrf.mxu0 }
 0x442   :  { %v2201_v6 = vadd.f32 %v3988_v22, %v2200_v40 }
 0x444   :  { %v2266_v32 = vpop.f32.mrf.mxu1 }
 0x445   :  { %v2267_v15 = vadd.f32 %v2266_v32, %v2178_v9 }
 0x447   :  { %2315 = vst [vmem:[%s4170_s7 + $0xa8] sm:$0xff] %v2267_v15 }
 0x449   :  { %v2202_v16 = vpop.f32.mrf.mxu0 }
 0x44a   :  { %v2203_v21 = vadd.f32 %v3988_v22, %v2202_v16 }
 0x44c   :  { %v2269_v37 = vpop.f32.mrf.mxu1 }
 0x44d   :  { %v2270_v13 = vadd.f32 %v2269_v37, %v2181_v38 }
 0x44f   :  { %2316 = vst [vmem:[%s4170_s7 + $0xb0] sm:$0xff] %v2270_v13 }
 0x454   :  { %v2271_v19 = vpop.f32.mrf.mxu1 }
 0x455   :  { %v2272_v23 = vadd.f32 %v2271_v19, %v2183_v61 }
 0x457   :  { %2317 = vst [vmem:[%s4170_s7 + $0xb8] sm:$0xff] %v2272_v23 }
 0x45c   :  { %v2274_v59 = vpop.f32.mrf.mxu1 }
 0x45d   :  { %v2275_v54 = vadd.f32 %v2274_v59, %v2186_v39 }
 0x45f   :  { %2318 = vst [vmem:[%s4170_s7 + $0xc0] sm:$0xff] %v2275_v54 }
 0x464   :  { %v2276_v51 = vpop.f32.mrf.mxu1 }
 0x465   :  { %v2277_v4 = vadd.f32 %v2276_v51, %v2188_v29 }
 0x467   :  { %2319 = vst [vmem:[%s4170_s7 + $0xc8] sm:$0xff] %v2277_v4 }
 0x46c   :  { %v2279_v41 = vpop.f32.mrf.mxu1 }
 0x46d   :  { %v2280_v11 = vadd.f32 %v2279_v41, %v2191_v57 }
 0x46f   :  { %2320 = vst [vmem:[%s4170_s7 + $0xd0] sm:$0xff] %v2280_v11 }
 0x474   :  { %v2281_v31 = vpop.f32.mrf.mxu1 }
 0x475   :  { %v2282_v45 = vadd.f32 %v2281_v31, %v2193_v55 }
 0x477   :  { %2321 = vst [vmem:[%s4170_s7 + $0xd8] sm:$0xff] %v2282_v45 }
 0x47c   :  { %v2284_v44 = vpop.f32.mrf.mxu1 }
 0x47d   :  { %v2285_v5 = vadd.f32 %v2284_v44, %v2196_v24 }
 0x47f   :  { %2322 = vst [vmem:[%s4170_s7 + $0xe0] sm:$0xff] %v2285_v5 }
 0x484   :  { %v2286_v53 = vpop.f32.mrf.mxu1 }
 0x485   :  { %v2287_v2 = vadd.f32 %v2286_v53, %v2198_v20 }
 0x487   :  { %2323 = vst [vmem:[%s4170_s7 + $0xe8] sm:$0xff] %v2287_v2 }
 0x48c   :  { %v2289_v60 = vpop.f32.mrf.mxu1 }
 0x48d   :  { %v2290_v63 = vadd.f32 %v2289_v60, %v2201_v6 }
 0x48f   :  { %2324 = vst [vmem:[%s4170_s7 + $0xf0] sm:$0xff] %v2290_v63 }
 0x494   :  { %v2291_v12 = vpop.f32.mrf.mxu1 }
 0x495   :  { %v2292_v58 = vadd.f32 %v2291_v12, %v2203_v21 }
 0x497   :  { %2325 = vst [vmem:[%s4170_s7 + $0xf8] sm:$0xff] %v2292_v58 }
 0x498   :  { %2330 = vsyncpa [#allocation3], 1 }

</bundles_post_ra>
